<compile_context>
chip_gen: v7x
topology: tpu7x:2x2x1
jax: 0.10.0
libtpu: 0.0.40
codegen_flags: <defaults>
</compile_context>

<pallas_src>
import jax
import jax.numpy as jnp
from jax import lax
from jax.experimental import pallas as pl
from jax.experimental.pallas import tpu as pltpu

BN_EPS = 1e-5
TK = 1024          # weight-tile rows  (input features per grid step)
TN = 512           # weight-tile cols  (output features per grid step)
ACT_W = 2048       # max (padded) feature width of any activation
X_PAD = 128        # network input padded to one lane-aligned slab
OUT_FEATURES = 1

# meta rows (int32 schedule, one column per grid step)
_READ_OFF, _WRITE_OFF, _FIRST_K, _LAST_K, _IS_OUT = range(5)


def _round_up(x, m):
    return (x + m - 1) // m * m


def _fused_mlp_kernel(meta_ref, x_ref, w_ref, g_ref, b_ref, o_ref,
                      acc_ref, acts_ref):
    s = pl.program_id(0)

    # One-time init: zero the ping-pong activation scratch (padded regions must
    # read as 0.0, never stale VMEM garbage) and drop the input batch in.
    @pl.when(s == 0)
    def _():
        acts_ref[...] = jnp.zeros_like(acts_ref)
        acts_ref[:, 0:X_PAD] = x_ref[...]

    read_off = pl.multiple_of(meta_ref[_READ_OFF, s], TK)
    write_off = pl.multiple_of(meta_ref[_WRITE_OFF, s], TN)
    first_k = meta_ref[_FIRST_K, s]
    last_k = meta_ref[_LAST_K, s]
    is_out = meta_ref[_IS_OUT, s]

    @pl.when(first_k == 1)
    def _():
        acc_ref[...] = jnp.zeros_like(acc_ref)

    # bf16 operands on the MXU, f32 accumulation.
    a = acts_ref[:, pl.ds(read_off, TK)].astype(jnp.bfloat16)
    acc_ref[...] += jnp.dot(a, w_ref[0], preferred_element_type=jnp.float32)

    # BatchNorm (training mode: batch mean, biased variance) + ReLU epilogue.
    @pl.when(jnp.logical_and(last_k == 1, is_out == 0))
    def _():
        y = acc_ref[...]
        mean = jnp.mean(y, axis=0, keepdims=True)
        var = jnp.mean(jnp.square(y - mean), axis=0, keepdims=True)
        scale = g_ref[0] * lax.rsqrt(var + BN_EPS)          # fold gamma
        shift = b_ref[0] - mean * scale
        acts_ref[:, pl.ds(write_off, TN)] = jnp.maximum(y * scale + shift, 0.0)

    # Final Linear epilogue (bias kept, no BN / ReLU).
    @pl.when(jnp.logical_and(last_k == 1, is_out == 1))
    def _():
        o_ref[...] = acc_ref[...] + b_ref[0]


def init_params(key, in_features=22, hidden=128, out_features=OUT_FEATURES):
    """PyTorch-default init; Linear weights stored transposed as (in, out)."""
    dims = [in_features, hidden, hidden * 2, hidden * 4, hidden * 8,
            hidden * 16, hidden * 16, hidden * 8, hidden * 4]
    layers = []
    for i in range(8):
        k_in, k_out = dims[i], dims[i + 1]
        key, kw, kb = jax.random.split(key, 3)
        bound = 1.0 / (k_in ** 0.5)
        w = jax.random.uniform(kw, (k_in, k_out), jnp.float32, -bound, bound)
        b = jax.random.uniform(kb, (1, k_out), jnp.float32, -bound, bound)
        gamma = jnp.ones((1, k_out), jnp.float32)
        beta = jnp.zeros((1, k_out), jnp.float32)
        layers.append((w, b, gamma, beta))
    key, kw, kb = jax.random.split(key, 3)
    bound = 1.0 / (dims[-1] ** 0.5)
    w_out = jax.random.uniform(kw, (dims[-1], out_features), jnp.float32,
                               -bound, bound)
    b_out = jax.random.uniform(kb, (1, out_features), jnp.float32, -bound, bound)
    return layers, (w_out, b_out)


def pack_params(layers, out_params):
    """Pack all weights into a uniform (S, TK, TN) bf16 tile stream plus
    per-step gamma/beta tiles and an int32 schedule for the fused kernel."""
    w_out, b_out = out_params
    # BN-layer biases are intentionally dropped (cancelled by BatchNorm).
    specs = [(w, gamma, beta, False) for (w, _b, gamma, beta) in layers]
    specs.append((w_out, None, b_out, True))

    w_tiles, g_tiles, b_tiles, meta = [], [], [], []
    for l, (w, gamma, beta, is_out) in enumerate(specs):
        k, n = w.shape
        k_pad, n_pad = _round_up(k, TK), _round_up(n, TN)
        wp = jnp.pad(w.astype(jnp.bfloat16), ((0, k_pad - k), (0, n_pad - n)))
        if is_out:
            gp = jnp.ones((n_pad,), jnp.float32)                       # unused
            bp = jnp.pad(beta.reshape(-1), (0, n_pad - n))             # bias
        else:
            gp = jnp.pad(gamma.reshape(-1), (0, n_pad - n), constant_values=1.0)
            bp = jnp.pad(beta.reshape(-1), (0, n_pad - n))             # beta=0 pad
        in_base = (l % 2) * ACT_W          # ping-pong activation buffers
        out_base = ((l + 1) % 2) * ACT_W
        nk, nn = k_pad // TK, n_pad // TN
        for ni in range(nn):               # n-tile outer
            for ki in range(nk):           # k-tile inner (accumulation)
                w_tiles.append(wp[ki * TK:(ki + 1) * TK, ni * TN:(ni + 1) * TN])
                g_tiles.append(gp[None, ni * TN:(ni + 1) * TN])
                b_tiles.append(bp[None, ni * TN:(ni + 1) * TN])
                meta.append([in_base + ki * TK,
                             out_base + ni * TN,
                             int(ki == 0),
                             int(ki == nk - 1),
                             int(is_out)])
    w_packed = jnp.stack(w_tiles)                      # (S, TK, TN) bf16
    g_packed = jnp.stack(g_tiles)                      # (S, 1, TN)  f32
    b_packed = jnp.stack(b_tiles)                      # (S, 1, TN)  f32
    meta = jnp.asarray(meta, dtype=jnp.int32).T        # (5, S) -> SMEM
    return meta, w_packed, g_packed, b_packed


def nn_forward(x, packed):
    """x: (B, 22) f32 -> (B, 1) f32.  Single fused pallas_call."""
    meta, w_packed, g_packed, b_packed = packed
    bsz, in_features = x.shape
    x_pad = jnp.zeros((bsz, X_PAD), jnp.float32).at[:, :in_features].set(
        x.astype(jnp.float32))
    steps = w_packed.shape[0]

    out_pad = pl.pallas_call(
        _fused_mlp_kernel,
        out_shape=jax.ShapeDtypeStruct((bsz, TN), jnp.float32),
        grid_spec=pltpu.PrefetchScalarGridSpec(
            num_scalar_prefetch=1,               # int32 schedule in SMEM
            grid=(steps,),
            in_specs=[
                pl.BlockSpec((bsz, X_PAD), lambda s, m: (0, 0)),    # x (resident)
                pl.BlockSpec((1, TK, TN), lambda s, m: (s, 0, 0)),  # weight stream
                pl.BlockSpec((1, 1, TN), lambda s, m: (s, 0, 0)),   # gamma tile
                pl.BlockSpec((1, 1, TN), lambda s, m: (s, 0, 0)),   # beta / bias
            ],
            out_specs=pl.BlockSpec((bsz, TN), lambda s, m: (0, 0)),  # resident
            scratch_shapes=[
                pltpu.VMEM((bsz, TN), jnp.float32),         # k-accumulator
                pltpu.VMEM((bsz, 2 * ACT_W), jnp.float32),  # ping-pong activations
            ],
        ),
        compiler_params=pltpu.CompilerParams(
            dimension_semantics=("arbitrary",),   # layers are sequentially dependent
            vmem_limit_bytes=32 * 1024 * 1024,
        ),
    )(meta, x_pad, w_packed, g_packed, b_packed)
    return out_pad[:, :OUT_FEATURES]


def nn_forward_ref(x, layers, out_params):
    """Pure-JAX reference (PyTorch training-mode BatchNorm), mimicking the
    kernel's bf16 matmul operands with f32 accumulation."""
    def mm(a, w):
        return jnp.dot(a.astype(jnp.bfloat16).astype(jnp.float32),
                       w.astype(jnp.bfloat16).astype(jnp.float32))
    h = x
    for (w, b, gamma, beta) in layers:
        y = mm(h, w) + b
        mean = jnp.mean(y, axis=0, keepdims=True)
        var = jnp.mean((y - mean) ** 2, axis=0, keepdims=True)
        y = (y - mean) * lax.rsqrt(var + BN_EPS)
        h = jnp.maximum(y * gamma + beta, 0.0)
    w_out, b_out = out_params
    return mm(h, w_out) + b_out


if __name__ == "__main__":
    key = jax.random.PRNGKey(0)
    key_p, key_x = jax.random.split(key)

    B, IN = 8, 22  # BatchNorm1d statistics are per-batch; keep B as given.
    layers, out_params = init_params(key_p, in_features=IN)
    packed = pack_params(layers, out_params)
    x = jax.random.normal(key_x, (B, IN), jnp.float32)

    fwd = jax.jit(nn_forward)
    y = jax.block_until_ready(fwd(x, packed))

    y_ref = nn_forward_ref(x, layers, out_params)
    assert y.shape == (B, OUT_FEATURES), y.shape
    max_err = float(jnp.max(jnp.abs(y - y_ref)))
    assert jnp.allclose(y, y_ref, atol=2e-2, rtol=2e-2), max_err
    print("KERNEL_OK")
</pallas_src>

<mosaic_0001>
module attributes {stable_mosaic.version = 11 : i64} {
  func.func @_fused_mlp_kernel(%arg0: i32, %arg1: memref<5x23xi32, #tpu.memory_space<smem>>, %arg2: memref<8x128xf32, #tpu.memory_space<vmem>>, %arg3: memref<1x1024x512xbf16, #tpu.memory_space<vmem>>, %arg4: memref<1x1x512xf32, #tpu.memory_space<vmem>>, %arg5: memref<1x1x512xf32, #tpu.memory_space<vmem>>, %arg6: memref<8x512xf32, #tpu.memory_space<vmem>>, %arg7: memref<8x512xf32, #tpu.memory_space<vmem>>, %arg8: memref<8x4096xf32, #tpu.memory_space<vmem>>) attributes {dimension_semantics = [#tpu.dimension_semantics<arbitrary>], iteration_bounds = array<i64: 23>, scalar_prefetch = 1 : i64, scratch_operands = 2 : i64, tpu.core_type = #tpu.core_type<tc>, window_params = [{pipeline_mode = #tpu.pipeline_mode<synchronous>, transform_indices = @transform_0, window_bounds = array<i64: 8, 128>}, {transform_indices = @transform_1, window_bounds = array<i64: 1, 1024, 512>}, {transform_indices = @transform_2, window_bounds = array<i64: 1, 1, 512>}, {transform_indices = @transform_3, window_bounds = array<i64: 1, 1, 512>}, {pipeline_mode = #tpu.pipeline_mode<synchronous>, transform_indices = @transform_4, window_bounds = array<i64: 8, 512>}]} {
    %c0_i32 = arith.constant 0 : i32
    %0 = arith.cmpi eq, %arg0, %c0_i32 : i32
    %1 = arith.extui %0 : i1 to i32
    %c0_i32_0 = arith.constant 0 : i32
    %2 = arith.cmpi ne, %1, %c0_i32_0 : i32
    scf.if %2 {
      %cst_16 = arith.constant 0.000000e+00 : f32
      %37 = vector.broadcast %cst_16 : f32 to vector<8x4096xf32>
      %c0_17 = arith.constant 0 : index
      %c0_18 = arith.constant 0 : index
      %38 = vector.load %arg8[%c0_17, %c0_18] : memref<8x4096xf32, #tpu.memory_space<vmem>>, vector<8x4096xf32>
      tpu.vector_store %arg8[%c0_17, %c0_18], %37 {strides = array<i32>} : memref<8x4096xf32, #tpu.memory_space<vmem>>, vector<8x4096xf32>,
      %c0_19 = arith.constant 0 : index
      %c0_20 = arith.constant 0 : index
      %39 = vector.load %arg2[%c0_19, %c0_20] : memref<8x128xf32, #tpu.memory_space<vmem>>, vector<8x128xf32>
      %c0_21 = arith.constant 0 : index
      %c0_22 = arith.constant 0 : index
      %40 = vector.load %arg8[%c0_21, %c0_22] : memref<8x4096xf32, #tpu.memory_space<vmem>>, vector<8x128xf32>
      tpu.vector_store %arg8[%c0_21, %c0_22], %39 {strides = array<i32>} : memref<8x4096xf32, #tpu.memory_space<vmem>>, vector<8x128xf32>,
    } else {
    }
    %c0 = arith.constant 0 : index
    %3 = arith.index_cast %arg0 : i32 to index
    %4 = memref.load %arg1[%c0, %3] : memref<5x23xi32, #tpu.memory_space<smem>>
    %5 = tpu.assume_multiple %4, 1024 : i32
    %c1 = arith.constant 1 : index
    %6 = arith.index_cast %arg0 : i32 to index
    %7 = memref.load %arg1[%c1, %6] : memref<5x23xi32, #tpu.memory_space<smem>>
    %8 = tpu.assume_multiple %7, 512 : i32
    %c2 = arith.constant 2 : index
    %9 = arith.index_cast %arg0 : i32 to index
    %10 = memref.load %arg1[%c2, %9] : memref<5x23xi32, #tpu.memory_space<smem>>
    %c3 = arith.constant 3 : index
    %11 = arith.index_cast %arg0 : i32 to index
    %12 = memref.load %arg1[%c3, %11] : memref<5x23xi32, #tpu.memory_space<smem>>
    %c4 = arith.constant 4 : index
    %13 = arith.index_cast %arg0 : i32 to index
    %14 = memref.load %arg1[%c4, %13] : memref<5x23xi32, #tpu.memory_space<smem>>
    %c1_i32 = arith.constant 1 : i32
    %15 = arith.cmpi eq, %10, %c1_i32 : i32
    %16 = arith.extui %15 : i1 to i32
    %c0_i32_1 = arith.constant 0 : i32
    %17 = arith.cmpi ne, %16, %c0_i32_1 : i32
    scf.if %17 {
      %cst_16 = arith.constant 0.000000e+00 : f32
      %37 = vector.broadcast %cst_16 : f32 to vector<8x512xf32>
      %c0_17 = arith.constant 0 : index
      %c0_18 = arith.constant 0 : index
      %38 = vector.load %arg7[%c0_17, %c0_18] : memref<8x512xf32, #tpu.memory_space<vmem>>, vector<8x512xf32>
      tpu.vector_store %arg7[%c0_17, %c0_18], %37 {strides = array<i32>} : memref<8x512xf32, #tpu.memory_space<vmem>>, vector<8x512xf32>,
    } else {
    }
    %c0_2 = arith.constant 0 : index
    %18 = arith.index_cast %5 : i32 to index
    %19 = vector.load %arg8[%c0_2, %18] : memref<8x4096xf32, #tpu.memory_space<vmem>>, vector<8x1024xf32>
    %20 = arith.truncf %19 : vector<8x1024xf32> to vector<8x1024xbf16>
    %c0_3 = arith.constant 0 : index
    %c0_4 = arith.constant 0 : index
    %21 = vector.load %arg7[%c0_3, %c0_4] : memref<8x512xf32, #tpu.memory_space<vmem>>, vector<8x512xf32>
    %c0_5 = arith.constant 0 : index
    %c0_6 = arith.constant 0 : index
    %c0_7 = arith.constant 0 : index
    %22 = vector.load %arg3[%c0_5, %c0_6, %c0_7] : memref<1x1024x512xbf16, #tpu.memory_space<vmem>>, vector<1x1024x512xbf16>
    %23 = vector.shape_cast %22 : vector<1x1024x512xbf16> to vector<1024x512xbf16>
    %cst = arith.constant dense<0.000000e+00> : vector<8x512xf32>
    %24 = tpu.matmul %20, %23, %cst {dimension_numbers = #tpu.dot_dimension_numbers<[1], [0], [0], [1], [0, 0, 1, 1], [], []>} : vector<8x1024xbf16>, vector<1024x512xbf16>, vector<8x512xf32> -> vector<8x512xf32>
    %25 = arith.addf %21, %24 : vector<8x512xf32>
    %c0_8 = arith.constant 0 : index
    %c0_9 = arith.constant 0 : index
    %26 = vector.load %arg7[%c0_8, %c0_9] : memref<8x512xf32, #tpu.memory_space<vmem>>, vector<8x512xf32>
    tpu.vector_store %arg7[%c0_8, %c0_9], %25 {strides = array<i32>} : memref<8x512xf32, #tpu.memory_space<vmem>>, vector<8x512xf32>,
    %c1_i32_10 = arith.constant 1 : i32
    %27 = arith.cmpi eq, %12, %c1_i32_10 : i32
    %c0_i32_11 = arith.constant 0 : i32
    %28 = arith.cmpi eq, %14, %c0_i32_11 : i32
    %29 = arith.andi %27, %28 : i1
    %30 = arith.extui %29 : i1 to i32
    %c0_i32_12 = arith.constant 0 : i32
    %31 = arith.cmpi ne, %30, %c0_i32_12 : i32
    scf.if %31 {
      %c0_16 = arith.constant 0 : index
      %c0_17 = arith.constant 0 : index
      %37 = vector.load %arg7[%c0_16, %c0_17] : memref<8x512xf32, #tpu.memory_space<vmem>>, vector<8x512xf32>
      %cst_18 = arith.constant dense<0.000000e+00> : vector<512xf32>
      %38 = vector.multi_reduction <add>, %37, %cst_18 [0] : vector<8x512xf32> to vector<512xf32>
      %39 = vector.shape_cast %38 : vector<512xf32> to vector<1x512xf32>
      %cst_19 = arith.constant 8.000000e+00 : f32
      %40 = vector.broadcast %cst_19 : f32 to vector<1x512xf32>
      %41 = arith.divf %39, %40 : vector<1x512xf32>
      %42 = vector.broadcast %41 : vector<1x512xf32> to vector<8x512xf32>
      %43 = arith.subf %37, %42 : vector<8x512xf32>
      %44 = arith.mulf %43, %43 : vector<8x512xf32>
      %cst_20 = arith.constant dense<0.000000e+00> : vector<512xf32>
      %45 = vector.multi_reduction <add>, %44, %cst_20 [0] : vector<8x512xf32> to vector<512xf32>
      %46 = vector.shape_cast %45 : vector<512xf32> to vector<1x512xf32>
      %cst_21 = arith.constant 8.000000e+00 : f32
      %47 = vector.broadcast %cst_21 : f32 to vector<1x512xf32>
      %48 = arith.divf %46, %47 : vector<1x512xf32>
      %c0_22 = arith.constant 0 : index
      %c0_23 = arith.constant 0 : index
      %c0_24 = arith.constant 0 : index
      %49 = vector.load %arg4[%c0_22, %c0_23, %c0_24] : memref<1x1x512xf32, #tpu.memory_space<vmem>>, vector<1x1x512xf32>
      %50 = vector.shape_cast %49 : vector<1x1x512xf32> to vector<1x512xf32>
      %cst_25 = arith.constant 9.99999974E-6 : f32
      %51 = vector.broadcast %cst_25 : f32 to vector<1x512xf32>
      %52 = arith.addf %48, %51 : vector<1x512xf32>
      %53 = math.rsqrt %52 : vector<1x512xf32>
      %54 = arith.mulf %50, %53 : vector<1x512xf32>
      %c0_26 = arith.constant 0 : index
      %c0_27 = arith.constant 0 : index
      %c0_28 = arith.constant 0 : index
      %55 = vector.load %arg5[%c0_26, %c0_27, %c0_28] : memref<1x1x512xf32, #tpu.memory_space<vmem>>, vector<1x1x512xf32>
      %56 = vector.shape_cast %55 : vector<1x1x512xf32> to vector<1x512xf32>
      %57 = arith.mulf %41, %54 : vector<1x512xf32>
      %58 = arith.subf %56, %57 : vector<1x512xf32>
      %59 = vector.broadcast %54 : vector<1x512xf32> to vector<8x512xf32>
      %60 = arith.mulf %37, %59 : vector<8x512xf32>
      %61 = vector.broadcast %58 : vector<1x512xf32> to vector<8x512xf32>
      %62 = arith.addf %60, %61 : vector<8x512xf32>
      %cst_29 = arith.constant 0.000000e+00 : f32
      %63 = vector.broadcast %cst_29 : f32 to vector<8x512xf32>
      %64 = arith.maximumf %62, %63 : vector<8x512xf32>
      %c0_30 = arith.constant 0 : index
      %65 = arith.index_cast %8 : i32 to index
      %66 = vector.load %arg8[%c0_30, %65] : memref<8x4096xf32, #tpu.memory_space<vmem>>, vector<8x512xf32>
      tpu.vector_store %arg8[%c0_30, %65], %64 {strides = array<i32>} : memref<8x4096xf32, #tpu.memory_space<vmem>>, vector<8x512xf32>,
    } else {
    }
    %c1_i32_13 = arith.constant 1 : i32
    %32 = arith.cmpi eq, %12, %c1_i32_13 : i32
    %c1_i32_14 = arith.constant 1 : i32
    %33 = arith.cmpi eq, %14, %c1_i32_14 : i32
    %34 = arith.andi %32, %33 : i1
    %35 = arith.extui %34 : i1 to i32
    %c0_i32_15 = arith.constant 0 : i32
    %36 = arith.cmpi ne, %35, %c0_i32_15 : i32
    scf.if %36 {
      %c0_16 = arith.constant 0 : index
      %c0_17 = arith.constant 0 : index
      %37 = vector.load %arg7[%c0_16, %c0_17] : memref<8x512xf32, #tpu.memory_space<vmem>>, vector<8x512xf32>
      %c0_18 = arith.constant 0 : index
      %c0_19 = arith.constant 0 : index
      %c0_20 = arith.constant 0 : index
      %38 = vector.load %arg5[%c0_18, %c0_19, %c0_20] : memref<1x1x512xf32, #tpu.memory_space<vmem>>, vector<1x1x512xf32>
      %39 = vector.shape_cast %38 : vector<1x1x512xf32> to vector<1x512xf32>
      %40 = vector.broadcast %39 : vector<1x512xf32> to vector<8x512xf32>
      %41 = arith.addf %37, %40 : vector<8x512xf32>
      %c0_21 = arith.constant 0 : index
      %c0_22 = arith.constant 0 : index
      %42 = vector.load %arg6[%c0_21, %c0_22] : memref<8x512xf32, #tpu.memory_space<vmem>>, vector<8x512xf32>
      tpu.vector_store %arg6[%c0_21, %c0_22], %41 {strides = array<i32>} : memref<8x512xf32, #tpu.memory_space<vmem>>, vector<8x512xf32>,
    } else {
    }
    return
  }
  func.func @transform_0(%arg0: i32, %arg1: memref<5x23xi32, #tpu.memory_space<smem>>) -> (i32, i32) {
    %c0_i32 = arith.constant 0 : i32
    %c0_i32_0 = arith.constant 0 : i32
    %c0_i32_1 = arith.constant 0 : i32
    return %c0_i32, %c0_i32_0 : i32, i32
  }
  func.func @transform_1(%arg0: i32, %arg1: memref<5x23xi32, #tpu.memory_space<smem>>) -> (i32, i32, i32) {
    %c0_i32 = arith.constant 0 : i32
    %c0_i32_0 = arith.constant 0 : i32
    %c0_i32_1 = arith.constant 0 : i32
    return %arg0, %c0_i32, %c0_i32_0 : i32, i32, i32
  }
  func.func @transform_2(%arg0: i32, %arg1: memref<5x23xi32, #tpu.memory_space<smem>>) -> (i32, i32, i32) {
    %c0_i32 = arith.constant 0 : i32
    %c0_i32_0 = arith.constant 0 : i32
    %c0_i32_1 = arith.constant 0 : i32
    return %arg0, %c0_i32, %c0_i32_0 : i32, i32, i32
  }
  func.func @transform_3(%arg0: i32, %arg1: memref<5x23xi32, #tpu.memory_space<smem>>) -> (i32, i32, i32) {
    %c0_i32 = arith.constant 0 : i32
    %c0_i32_0 = arith.constant 0 : i32
    %c0_i32_1 = arith.constant 0 : i32
    return %arg0, %c0_i32, %c0_i32_0 : i32, i32, i32
  }
  func.func @transform_4(%arg0: i32, %arg1: memref<5x23xi32, #tpu.memory_space<smem>>) -> (i32, i32) {
    %c0_i32 = arith.constant 0 : i32
    %c0_i32_0 = arith.constant 0 : i32
    %c0_i32_1 = arith.constant 0 : i32
    return %c0_i32, %c0_i32_0 : i32, i32
  }
}

</mosaic_0001>

<bundles_post_ra>
// kernel: nn_forward.1
= control target key start
LH: loop header
LB: loop body
LE: loop exit
PB: predicated region body
PF: predicated region fallthrough
CT: control target
= control target key end

     0   :  { %s4084_s0 = inlined_call_operand.hbm [shape: s32[5,23], index: 0, kind: input, shape index: {}]   ;;  %s4085_s1 = inlined_call_operand.vmem [shape: f32[8,128], index: 1, kind: input, shape index: {}]   ;;  %s4086_s2 = inlined_call_operand.hbm [shape: bf16[23,1024,512], index: 2, kind: input, shape index: {}]   ;;  %s4087_s3 = inlined_call_operand.hbm [shape: f32[23,1,512], index: 3, kind: input, shape index: {}]   ;;  %s4088_s4 = inlined_call_operand.hbm [shape: f32[23,1,512], index: 4, kind: input, shape index: {}]   ;;  %s4089_s5 = inlined_call_operand.vmem [shape: f32[8,512], index: 5, kind: output, shape index: {}]  }
   0x1   :  { %s3320_s20 = scalar_lea.hbm %s4084_s0, 128 }
   0x2   :  { %p3321_p0 = scmp.ne.s32.totalorder %s4084_s0, %s3320_s20  ;;  %p3324_p1 = scmp.lt.u32.totalorder %s3320_s20, %s4084_s0 }
   0x4   :  { %p3326_p2 = pnand %p3324_p1, %p3321_p0 }
   0x6   :  { %3329 = shalt.err (!%p3326_p2)  }
   0x7   :  { %s3462_s25 = smov [#allocation5]  }
   0x8   :  { %11 = dma.hbm_to_smem %s4084_s0, 128, %s3462_s25, [#allocation4] }
   0x9   :  { %3436 = dma.done.wait [#allocation4], 128 }
   0xa   :  { %3437 = vsyncadd [#allocation4], 4294967168 }
   0xb   :  { %13 = sfence }
   0xc   :  { %14 = vsyncpa [#allocation7], 0 }
   0xd   :  { %16 = vsyncpa [#allocation7 + $0x1], 0 }
   0xe   :  { %17 = vsyncpa [#allocation9], 0 }
   0xf   :  { %19 = vsyncpa [#allocation9 + $0x1], 0  ;;  %s3513_s28 = smov 0   ;;  %s3515_s29 = smov 0  }
  0x10   :  { %s3517_s30 = smov 0   ;;  %s3519_s6 = smov 0  }
  0x11 LB: > { %s3532_s0 = sadd.s32 4294967295, %s3460_s6   ;;  %s3535_s7 = sadd.s32 1, %s3460_s6   ;;  %s3460_s6 = sphi %s3519_s6, %s4103_s6   ;;  %s3456_s30 = sphi %s3517_s30, %s4102_s30   ;;  %s3452_s29 = sphi %s3515_s29, %s4101_s29   ;;  %s3448_s28 = sphi %s3513_s28, %s4100_s28  }
  0x12   : > { %s50_s8 = ssub.s32 %s3460_s6, %s3535_s7  ;;  %s53_s9 = sadd.s32 1, %s3456_s30 }
  0x13   : > { %p51_p3 = scmp.eq.s32.totalorder %s50_s8, 0  ;;  %p60_p4 = scmp.ne.s32.totalorder %s3456_s30, %s3452_s29 }
  0x14   : > { %p61_p5 = scmp.eq.s32.totalorder %s3460_s6, 0  ;;  %p66_p6 = scmp.ne.s32.totalorder %s3452_s29, %s3448_s28 }
  0x15   : > { %s3545_s10 = scalar_select %p51_p3, %s3456_s30, %s53_s9  }
  0x16   : > { %p62_p7 = por %p61_p5, %p60_p4  ;;  %p67_p8 = scmp.eq.s32.totalorder %s3532_s0, 0 }
  0x17   : > { %p2889_p9 = scmp.lt.s32.totalorder %s3460_s6, 23  ;;  %s3554_s12 = sand.u32 1, %s3456_s30  }
  0x18   : > { %p3549_p10 = por %p67_p8, %p66_p6  ;;  %s187_s14 = sand.u32 1, %s3460_s6  }
  0x19   : > { %p3556_p11 = pnand %p2889_p9, %p62_p7  ;;  %s2586_s15 = sshll.u32 %s3554_s12, 2 }
  0x1a   : > { %s4092_s11 = scalar_select %p3549_p10, 1, 0 }
  0x1b   : > { %s4093_s13 = scalar_select %p3556_p11, 1, 0 }
  0x1c   : > { %s2863_s16 = sshll.u32 %s3460_s6, 6  ;;  %s191_s17 = scalar_lea.vmem [#allocation8], %s2586_s15 }
  0x1d   : > { %s199_s18 = sshll.u32 %s191_s17, 4  ;;  %s3570_s21 = scalar_lea.hbm %s4087_s3, %s2863_s16  ;;  %s3572_s18 = int_to_ptr.vmem [resolvable:$true] %s199_s18 }
  0x1e   : > { %s3574_s22 = scalar_lea.sflag [#allocation9], %s187_s14  ;;  %s3330_s23 = scalar_lea.hbm %s3570_s21, 64 }
  0x1f   : > { %p3331_p12 = scmp.ne.s32.totalorder %s3570_s21, %s3330_s23  ;;  %p3580_p13 = pneg %p3556_p11 }
  0x20   : > { %s3335_s27 = scalar_lea.hbm %s4087_s3, 1472  ;;  %p3336_p2 = scmp.lt.u32.totalorder %s3570_s21, %s4087_s3 }
  0x21   : > { %p3333_p0 = pnand %p3580_p13, %p3331_p12  ;;  %p3337_p3 = scmp.lt.u32.totalorder %s3335_s27, %s3330_s23 }
  0x22   : > { %p3339_p5 = scmp.lt.u32.totalorder %s3330_s23, %s3570_s21 }
  0x23   : > { %p3334_p1 = pneg %p3333_p0  ;;  %p3338_p4 = por %p3337_p3, %p3336_p2 }
  0x25   : > { %p3340_p6 = por %p3339_p5, %p3338_p4 }
  0x27   : > { %p3341_p7 = pnand %p3340_p6, %p3334_p1 }
  0x29   : > { %3344 = shalt.err (!%p3341_p7)
}
  0x2a   : > { %s3345_s9 = scalar_lea.vmem %s3572_s18, 64  ;;  %s3463_s14 = smov [#allocation8]  }
  0x2b   : > { %p3346_p8 = scmp.ne.s32.totalorder %s3572_s18, %s3345_s9  ;;  %s3350_s17 = sshll.u32 %s3463_s14, 4  ;;  %s3351_s17 = int_to_ptr.vmem [resolvable:$false] %s3350_s17 }
  0x2c   : > { %s3352_s19 = scalar_lea.vmem %s3351_s17, 128  ;;  %p3353_p0 = scmp.lt.s32.totalorder %s3572_s18, %s3351_s17 }
  0x2d   : > { %p3348_p9 = pnand %p3346_p8, %p3580_p13  ;;  %p3354_p10 = scmp.lt.s32.totalorder %s3352_s19, %s3345_s9 }
  0x2f   : > { %p3349_p12 = pneg %p3348_p9  ;;  %p3355_p2 = por %p3354_p10, %p3353_p0 }
  0x31   : > { %p3356_p3 = pnand %p3355_p2, %p3349_p12 }
  0x33   : > { %3359 = shalt.err (!%p3356_p3)
}
  0x34   : > { %2885 = dma.hbm_to_vmem [thread:$0]  (!%p3556_p11), %s3570_s21, 64, %s3572_s18, %s3574_s22  }
  0x35   : > { %s3609_s25 = scalar_lea.hbm %s4088_s4, %s2863_s16  ;;  %p2592_p10 = scmp.ge.s32.totalorder %s3460_s6, 1 }
  0x36   : > { %p223_p1 = scmp.lt.s32.totalorder %s3460_s6, 24  ;;  %s2583_s26 = sshll.u32 %s3554_s12, 11 }
  0x37   : > { %s2862_s28 = sshll.u32 %s3460_s6, 15  ;;  %s170_s8 = scalar_lea.vmem [#allocation6], %s2583_s26 }
  0x38   : > { %p3614_p4 = pnand %p2592_p10, %p223_p1  ;;  %s177_s9 = sshll.u32 %s170_s8, 4  ;;  %s3624_s9 = int_to_ptr.vmem [resolvable:$true] %s177_s9 }
  0x39   : > { %s3622_s18 = scalar_lea.hbm %s4086_s2, %s2862_s28  ;;  %s167_s16 = scalar_lea.sflag [#allocation7], %s3554_s12 }
  0x3a   : > { %s4095_s27 = scalar_select %p3614_p4, 1, 0 }
  0x3b   : > { %s3360_s21 = scalar_lea.hbm %s3622_s18, 32768  ;;  %s3365_s20 = scalar_lea.hbm %s4086_s2, 753664 }
  0x3c   : > { %p3361_p5 = scmp.ne.s32.totalorder %s3622_s18, %s3360_s21  ;;  %p3366_p8 = scmp.lt.u32.totalorder %s3622_s18, %s4086_s2 }
  0x3d   : > { %p3367_p9 = scmp.lt.u32.totalorder %s3365_s20, %s3360_s21  ;;  %p3369_p0 = scmp.lt.u32.totalorder %s3360_s21, %s3622_s18 }
  0x3e   : > { %p3363_p6 = pnand %p3361_p5, %p3580_p13 }
  0x3f   : > { %p3368_p12 = por %p3367_p9, %p3366_p8 }
  0x40   : > { %p3364_p7 = pneg %p3363_p6 }
  0x41   : > { %p3370_p2 = por %p3369_p0, %p3368_p12 }
  0x43   : > { %p3371_p3 = pnand %p3370_p2, %p3364_p7 }
  0x45   : > { %3374 = shalt.err (!%p3371_p3)
}
  0x46   : > { %s3375_s28 = scalar_lea.vmem %s3624_s9, 32768  ;;  %s3464_s8 = smov [#allocation6]  }
  0x47   : > { %p3376_p10 = scmp.ne.s32.totalorder %s3624_s9, %s3375_s28  ;;  %s3380_s14 = sshll.u32 %s3464_s8, 4  ;;  %s3381_s14 = int_to_ptr.vmem [resolvable:$false] %s3380_s14 }
  0x48   : > { %s3382_s17 = scalar_lea.vmem %s3381_s14, 65536  ;;  %p3383_p6 = scmp.lt.s32.totalorder %s3624_s9, %s3381_s14 }
  0x49   : > { %p3378_p1 = pnand %p3376_p10, %p3580_p13  ;;  %p3384_p4 = scmp.lt.s32.totalorder %s3382_s17, %s3375_s28 }
  0x4b   : > { %p3379_p5 = pneg %p3378_p1  ;;  %p3385_p8 = por %p3384_p4, %p3383_p6 }
  0x4d   : > { %p3386_p9 = pnand %p3385_p8, %p3379_p5 }
  0x4f   : > { %3389 = shalt.err (!%p3386_p9)
}
  0x50   : > { %s3465_s21 = smov 256   ;;  %s3466_s6 = smov 16  }
  0x51   : > { %2882 = dma.hbm_to_vmem [thread:$0]  (!%p3556_p11), %s3622_s18, 32768, %s3624_s9, %s167_s16, %s3465_s21, %s3465_s21, %s3466_s6  }
  0x52   : > { %s210_s19 = scalar_lea.vmem [#allocation10], %s2586_s15  ;;  %s3390_s23 = scalar_lea.hbm %s3609_s25, 64 }
  0x53   : > { %s218_s20 = sshll.u32 %s210_s19, 4  ;;  %p3391_p4 = scmp.ne.s32.totalorder %s3609_s25, %s3390_s23  ;;  %s219_s20 = int_to_ptr.vmem [resolvable:$true] %s218_s20 }
  0x54   : > { %s3395_s8 = scalar_lea.hbm %s4088_s4, 1472  ;;  %p3396_p0 = scmp.lt.u32.totalorder %s3609_s25, %s4088_s4 }
  0x55   : > { %p3393_p7 = pnand %p3391_p4, %p3580_p13  ;;  %p3397_p2 = scmp.lt.u32.totalorder %s3395_s8, %s3390_s23 }
  0x56   : > { %p3399_p10 = scmp.lt.u32.totalorder %s3390_s23, %s3609_s25 }
  0x57   : > { %p3394_p12 = pneg %p3393_p7  ;;  %p3398_p3 = por %p3397_p2, %p3396_p0 }
  0x59   : > { %p3400_p1 = por %p3399_p10, %p3398_p3 }
  0x5b   : > { %p3401_p5 = pnand %p3400_p1, %p3394_p12 }
  0x5d   : > { %3404 = shalt.err (!%p3401_p5)
}
  0x5e   : > { %s3405_s12 = scalar_lea.vmem %s219_s20, 64  ;;  %s3467_s15 = smov [#allocation10]  }
  0x5f   : > { %p3406_p6 = scmp.ne.s32.totalorder %s219_s20, %s3405_s12  ;;  %s3410_s9 = sshll.u32 %s3467_s15, 4  ;;  %s3411_s9 = int_to_ptr.vmem [resolvable:$false] %s3410_s9 }
  0x60   : > { %s3412_s18 = scalar_lea.vmem %s3411_s9, 128  ;;  %p3413_p4 = scmp.lt.s32.totalorder %s219_s20, %s3411_s9 }
  0x61   : > { %p3408_p8 = pnand %p3406_p6, %p3580_p13  ;;  %p3414_p7 = scmp.lt.s32.totalorder %s3412_s18, %s3405_s12 }
  0x63   : > { %p3409_p9 = pneg %p3408_p8  ;;  %p3415_p11 = por %p3414_p7, %p3413_p4 }
  0x65   : > { %p3416_p0 = pnand %p3415_p11, %p3409_p9 }
  0x67   : > { %3419 = shalt.err (!%p3416_p0)
}
  0x68   : > { %p4096_p2 = scmp.ne.s32.totalorder %s4093_s13, 0  ;;  %p4097_p12 = scmp.ne.s32.totalorder %s4095_s27, 0 }
  0x69   : > { %s229_s24 = sand.u32 (!%p4097_p12), 1, %s3452_s29   ;;  %p4098_p13 = scmp.ne.s32.totalorder (!%p4097_p12), %s4092_s11, 0 }
  0x6a   : > { %2888 = dma.hbm_to_vmem [thread:$0]  (!%p4096_p2), %s3609_s25, 64, %s219_s20, %s3574_s22  }
  0x6b   : > { %227 = sbr.rel (%p4097_p12) target bundleno = 732 (0x2dc), region = 36  ;;  %s2593_s16 = sshll.u32 (!%p4097_p12), %s229_s24, 11 }
  0x6c   : > { %s230_s21 = scalar_lea.sflag (!%p4097_p12), [#allocation7], %s229_s24  ;;  %s3673_s6 = scalar_lea.vmem (!%p4097_p12), [#allocation6], %s2593_s16 }
  0x72   : > { %3439 = dma.done.wait (%p4098_p13), %s230_s21, 32768  }
  0x73   : > { %3441 = vsyncadd (%p4098_p13), %s230_s21, 4294934528  ;;  %s238_s13 = sand.u32 1, %s3532_s0   ;;  %s2594_s19 = sshll.u32 %s229_s24, 2 }
  0x74   : > { %s239_s22 = scalar_lea.sflag [#allocation9], %s238_s13  ;;  %s3680_s25 = scalar_lea.vmem [#allocation8], %s2594_s19 }
  0x75   : > { %3443 = dma.done.wait (%p4098_p13), %s239_s22, 128  }
  0x76   : > { %3445 = vsyncadd (%p4098_p13), %s239_s22, 4294967168  ;;  %s3686_s27 = scalar_lea.vmem [#allocation10], %s2594_s19  ;;  %p2596_p11 = scmp.ne.s32.totalorder %s3532_s0, 0 }
  0x77   : > { %v317_v0 = vld [vmem:[%s4085_s1] sm:$0xff] (!%p2596_p11)  ;;  %v3468_v1 = vmov (!%p2596_p11), 0.0  }
  0x78   : > { %284 = sbr.rel (%p2596_p11) target bundleno = 136 (0x88), region = 52  ;;  %286 = vst [vmem:[#allocation3 + $0x8] sm:$0xff] (!%p2596_p11), %v3468_v1  ;;  %287 = vst [vmem:[#allocation3 + $0x10] sm:$0xff] (!%p2596_p11), %v3468_v1 }
  0x79   : > { %288 = vst [vmem:[#allocation3 + $0x18] sm:$0xff] (!%p2596_p11), %v3468_v1  ;;  %289 = vst [vmem:[#allocation3 + $0x20] sm:$0xff] (!%p2596_p11), %v3468_v1 }
  0x7a   : > { %290 = vst [vmem:[#allocation3 + $0x28] sm:$0xff] (!%p2596_p11), %v3468_v1  ;;  %291 = vst [vmem:[#allocation3 + $0x30] sm:$0xff] (!%p2596_p11), %v3468_v1 }
  0x7b   : > { %292 = vst [vmem:[#allocation3 + $0x38] sm:$0xff] (!%p2596_p11), %v3468_v1  ;;  %293 = vst [vmem:[#allocation3 + $0x40] sm:$0xff] (!%p2596_p11), %v3468_v1 }
  0x7c   : > { %294 = vst [vmem:[#allocation3 + $0x48] sm:$0xff] (!%p2596_p11), %v3468_v1  ;;  %295 = vst [vmem:[#allocation3 + $0x50] sm:$0xff] (!%p2596_p11), %v3468_v1 }
  0x7d   : > { %296 = vst [vmem:[#allocation3 + $0x58] sm:$0xff] (!%p2596_p11), %v3468_v1  ;;  %297 = vst [vmem:[#allocation3 + $0x60] sm:$0xff] (!%p2596_p11), %v3468_v1 }
  0x7e   : > { %298 = vst [vmem:[#allocation3 + $0x68] sm:$0xff] (!%p2596_p11), %v3468_v1  ;;  %299 = vst [vmem:[#allocation3 + $0x70] sm:$0xff] (!%p2596_p11), %v3468_v1 }
  0x7f   : > { %300 = vst [vmem:[#allocation3 + $0x78] sm:$0xff] %v3468_v1  ;;  %301 = vst [vmem:[#allocation3 + $0x80] sm:$0xff] %v3468_v1 }
  0x80   : > { %302 = vst [vmem:[#allocation3 + $0x88] sm:$0xff] %v3468_v1  ;;  %303 = vst [vmem:[#allocation3 + $0x90] sm:$0xff] %v3468_v1 }
  0x81   : > { %304 = vst [vmem:[#allocation3 + $0x98] sm:$0xff] %v3468_v1  ;;  %305 = vst [vmem:[#allocation3 + $0xa0] sm:$0xff] %v3468_v1 }
  0x82   : > { %306 = vst [vmem:[#allocation3 + $0xa8] sm:$0xff] %v3468_v1  ;;  %307 = vst [vmem:[#allocation3 + $0xb0] sm:$0xff] %v3468_v1 }
  0x83   : > { %308 = vst [vmem:[#allocation3 + $0xb8] sm:$0xff] %v3468_v1  ;;  %309 = vst [vmem:[#allocation3 + $0xc0] sm:$0xff] %v3468_v1 }
  0x84   : > { %310 = vst [vmem:[#allocation3 + $0xc8] sm:$0xff] %v3468_v1  ;;  %311 = vst [vmem:[#allocation3 + $0xd0] sm:$0xff] %v3468_v1 }
  0x85   : > { %312 = vst [vmem:[#allocation3 + $0xd8] sm:$0xff] %v3468_v1  ;;  %313 = vst [vmem:[#allocation3 + $0xe0] sm:$0xff] %v3468_v1 }
  0x86   : > { %314 = vst [vmem:[#allocation3 + $0xe8] sm:$0xff] %v3468_v1  ;;  %315 = vst [vmem:[#allocation3 + $0xf0] sm:$0xff] %v3468_v1 }
  0x87   : > { %316 = vst [vmem:[#allocation3 + $0xf8] sm:$0xff] %v3468_v1  ;;  %318 = vst [vmem:[#allocation3] sm:$0xff] %v317_v0 }
  0x88 PF: > { %s3693_s11 = sld [smem:[#allocation5 + %s3532_s0]]  ;;  %s320_s26 = sshra.s32 %s3532_s0, 7 }
  0x89   : > { %s2865_s28 = sshll.u32 %s320_s26, 7  ;;  %s325_s8 = sand.u32 127, %s3532_s0 }
  0x8a   : > { %s2866_s14 = sadd.s32 128, %s2865_s28  ;;  %s2868_s17 = sadd.s32 256, %s2865_s28 }
  0x8b   : > { %s326_s12 = sadd.s32 %s2866_s14, %s325_s8  ;;  %s330_s15 = sadd.s32 %s2868_s17, %s325_s8 }
  0x8c   : > { %s3697_s9 = sld [smem:[#allocation5 + %s326_s12]]  ;;  %s2870_s24 = sadd.s32 384, %s2865_s28 }
  0x8d   : > { %s331_s18 = sld [smem:[#allocation5 + %s330_s15]]  ;;  %s2872_s16 = sadd.s32 512, %s2865_s28 }
  0x8e   : > { %s334_s21 = sadd.s32 %s2870_s24, %s325_s8  ;;  %s338_s13 = sadd.s32 %s2872_s16, %s325_s8 }
  0x8f   : > { %s3699_s19 = sld [smem:[#allocation5 + %s334_s21]] }
  0x90   : > { %s3701_s22 = sld [smem:[#allocation5 + %s338_s13]] }
  0x93   : > { %p2601_p3 = scmp.ne.s32.totalorder %s331_s18, 1 }
  0x94   : > { %v3469_v2 = vmov (!%p2601_p3), 0.0  }
  0x95   : > { %343 = sbr.rel (%p2601_p3) target bundleno = 156 (0x9c), region = 56  ;;  %344 = vst [vmem:[#allocation2] sm:$0xff] (!%p2601_p3), %v3469_v2  ;;  %345 = vst [vmem:[#allocation2 + $0x8] sm:$0xff] (!%p2601_p3), %v3469_v2 }
  0x96   : > { %346 = vst [vmem:[#allocation2 + $0x10] sm:$0xff] (!%p2601_p3), %v3469_v2  ;;  %347 = vst [vmem:[#allocation2 + $0x18] sm:$0xff] (!%p2601_p3), %v3469_v2 }
  0x9c PF: > { %v2928_v3 = vld [vmem:[%s3673_s6 + $0x4] ss:$16 sps:$4 sm:$0xff]   ;;  %v2932_v5 = vld [vmem:[%s3673_s6] ss:$16 sps:$4 sm:$0xff]   ;;  %s348_s0 = sshra.s32 %s3693_s11, 7  ;;  %p2244_p10 = scmp.eq.s32.totalorder %s3699_s19, 1 }
  0x9d   : > { %v2930_v4 = vld [vmem:[%s3673_s6 + $0x204] ss:$16 sps:$4 sm:$0xff]   ;;  %1908 = vmatprep.subr.bf16.mxu0 %v2928_v3  ;;  %v2933_v6 = vld [vmem:[%s3673_s6 + $0x200] ss:$16 sps:$4 sm:$0xff]   ;;  %s2602_s20 = sshll.u32 %s348_s0, 3  ;;  %p2245_p1 = scmp.eq.s32.totalorder %s3701_s22, 0 }
  0x9e   : > { %1949 = vmatprep.subr.bf16.mxu1 %v2930_v4  ;;  %v2934_v7 = vld [vmem:[%s3673_s6 + $0x24] ss:$16 sps:$4 sm:$0xff]   ;;  %1909 = vmatpush1.bf16.msra.mxu0 %v2932_v5  ;;  %v2938_v9 = vld [vmem:[%s3673_s6 + $0x20] ss:$16 sps:$4 sm:$0xff]   ;;  %s3750_s23 = scalar_lea.vmem [#allocation3], %s2602_s20 }
  0x9f   : > { %1950 = vmatpush1.bf16.msra.mxu1 %v2933_v6  ;;  %v2936_v8 = vld [vmem:[%s3673_s6 + $0x224] ss:$16 sps:$4 sm:$0xff]   ;;  %1910 = vmatprep.subr.bf16.mxu0 %v2934_v7  ;;  %v2939_v10 = vld [vmem:[%s3673_s6 + $0x220] ss:$16 sps:$4 sm:$0xff]   ;;  %v353_v49 = vld [vmem:[%s3750_s23 + $0x8] sm:$0xff]  ;;  %p4006_p5 = pnand %p2245_p1, %p2244_p10 }
  0xa0   : > { %1951 = vmatprep.subr.bf16.mxu1 %v2936_v8  ;;  %v2940_v11 = vld [vmem:[%s3673_s6 + $0x44] ss:$16 sps:$4 sm:$0xff]   ;;  %v2944_v13 = vld [vmem:[%s3673_s6 + $0x40] ss:$16 sps:$4 sm:$0xff]   ;;  %v3755_v52 = vpack.c.bf16 %v353_v49, %v353_v49  ;;  %v355_v53 = vld [vmem:[%s3750_s23 + $0x18] sm:$0xff] }
  0xa1   : > { %v2942_v12 = vld [vmem:[%s3673_s6 + $0x244] ss:$16 sps:$4 sm:$0xff]   ;;  %v2945_v14 = vld [vmem:[%s3673_s6 + $0x240] ss:$16 sps:$4 sm:$0xff]   ;;  %v3759_v55 = vpack.c.bf16 %v355_v53, %v355_v53 }
  0xa2   : > { %1911 = vmatpush1.bf16.msra.mxu0 %v2938_v9  ;;  %v2946_v15 = vld [vmem:[%s3673_s6 + $0x64] ss:$16 sps:$4 sm:$0xff]   ;;  %v2950_v17 = vld [vmem:[%s3673_s6 + $0x60] ss:$16 sps:$4 sm:$0xff]   ;;  %1940 = vmatprep.mubr.bf16.mxu0 %v3755_v52 }
  0xa3   : > { %1952 = vmatpush1.bf16.msra.mxu1 %v2939_v10  ;;  %1912 = vmatprep.subr.bf16.mxu0 %v2940_v11  ;;  %v2948_v16 = vld [vmem:[%s3673_s6 + $0x264] ss:$16 sps:$4 sm:$0xff]   ;;  %v2951_v18 = vld [vmem:[%s3673_s6 + $0x260] ss:$16 sps:$4 sm:$0xff]  }
  0xa4   : > { %1953 = vmatprep.subr.bf16.mxu1 %v2942_v12  ;;  %v2952_v19 = vld [vmem:[%s3673_s6 + $0x84] ss:$16 sps:$4 sm:$0xff]   ;;  %v2956_v21 = vld [vmem:[%s3673_s6 + $0x80] ss:$16 sps:$4 sm:$0xff]   ;;  %1981 = vmatprep.mubr.bf16.mxu1 %v3759_v55 }
  0xa5   : > { %v2954_v20 = vld [vmem:[%s3673_s6 + $0x284] ss:$16 sps:$4 sm:$0xff]   ;;  %v2957_v22 = vld [vmem:[%s3673_s6 + $0x280] ss:$16 sps:$4 sm:$0xff]  }
  0xa6   : > { %1913 = vmatpush1.bf16.msra.mxu0 %v2944_v13  ;;  %v2958_v23 = vld [vmem:[%s3673_s6 + $0xa4] ss:$16 sps:$4 sm:$0xff]   ;;  %v2962_v25 = vld [vmem:[%s3673_s6 + $0xa0] ss:$16 sps:$4 sm:$0xff]  }
  0xa7   : > { %1954 = vmatpush1.bf16.msra.mxu1 %v2945_v14  ;;  %1914 = vmatprep.subr.bf16.mxu0 %v2946_v15  ;;  %v2960_v24 = vld [vmem:[%s3673_s6 + $0x2a4] ss:$16 sps:$4 sm:$0xff]   ;;  %v2963_v26 = vld [vmem:[%s3673_s6 + $0x2a0] ss:$16 sps:$4 sm:$0xff]  }
  0xa8   : > { %1955 = vmatprep.subr.bf16.mxu1 %v2948_v16  ;;  %v2964_v27 = vld [vmem:[%s3673_s6 + $0xc4] ss:$16 sps:$4 sm:$0xff]   ;;  %v2968_v29 = vld [vmem:[%s3673_s6 + $0xc0] ss:$16 sps:$4 sm:$0xff]  }
  0xa9   : > { %v2966_v28 = vld [vmem:[%s3673_s6 + $0x2c4] ss:$16 sps:$4 sm:$0xff]   ;;  %v2969_v30 = vld [vmem:[%s3673_s6 + $0x2c0] ss:$16 sps:$4 sm:$0xff]  }
  0xaa   : > { %1915 = vmatpush1.bf16.msra.mxu0 %v2950_v17  ;;  %v2970_v31 = vld [vmem:[%s3673_s6 + $0xe4] ss:$16 sps:$4 sm:$0xff]   ;;  %v2974_v33 = vld [vmem:[%s3673_s6 + $0xe0] ss:$16 sps:$4 sm:$0xff]  }
  0xab   : > { %1956 = vmatpush1.bf16.msra.mxu1 %v2951_v18  ;;  %1916 = vmatprep.subr.bf16.mxu0 %v2952_v19  ;;  %v2972_v32 = vld [vmem:[%s3673_s6 + $0x2e4] ss:$16 sps:$4 sm:$0xff]   ;;  %v2975_v34 = vld [vmem:[%s3673_s6 + $0x2e0] ss:$16 sps:$4 sm:$0xff]  }
  0xac   : > { %1957 = vmatprep.subr.bf16.mxu1 %v2954_v20  ;;  %v2976_v35 = vld [vmem:[%s3673_s6 + $0x104] ss:$16 sps:$4 sm:$0xff]   ;;  %v2980_v37 = vld [vmem:[%s3673_s6 + $0x100] ss:$16 sps:$4 sm:$0xff]  }
  0xad   : > { %v2978_v36 = vld [vmem:[%s3673_s6 + $0x304] ss:$16 sps:$4 sm:$0xff]   ;;  %v2981_v38 = vld [vmem:[%s3673_s6 + $0x300] ss:$16 sps:$4 sm:$0xff]  }
  0xae   : > { %1917 = vmatpush1.bf16.msra.mxu0 %v2956_v21  ;;  %v2982_v39 = vld [vmem:[%s3673_s6 + $0x124] ss:$16 sps:$4 sm:$0xff]   ;;  %v2986_v41 = vld [vmem:[%s3673_s6 + $0x120] ss:$16 sps:$4 sm:$0xff]  }
  0xaf   : > { %1958 = vmatpush1.bf16.msra.mxu1 %v2957_v22  ;;  %1918 = vmatprep.subr.bf16.mxu0 %v2958_v23  ;;  %v2984_v40 = vld [vmem:[%s3673_s6 + $0x324] ss:$16 sps:$4 sm:$0xff]   ;;  %v2987_v42 = vld [vmem:[%s3673_s6 + $0x320] ss:$16 sps:$4 sm:$0xff]  }
  0xb0   : > { %1959 = vmatprep.subr.bf16.mxu1 %v2960_v24  ;;  %v2988_v43 = vld [vmem:[%s3673_s6 + $0x144] ss:$16 sps:$4 sm:$0xff]   ;;  %v2992_v45 = vld [vmem:[%s3673_s6 + $0x140] ss:$16 sps:$4 sm:$0xff]  }
  0xb1   : > { %v2990_v44 = vld [vmem:[%s3673_s6 + $0x344] ss:$16 sps:$4 sm:$0xff]   ;;  %v2993_v46 = vld [vmem:[%s3673_s6 + $0x340] ss:$16 sps:$4 sm:$0xff]  }
  0xb2   : > { %1919 = vmatpush1.bf16.msra.mxu0 %v2962_v25  ;;  %v2994_v47 = vld [vmem:[%s3673_s6 + $0x164] ss:$16 sps:$4 sm:$0xff]   ;;  %v2998_v50 = vld [vmem:[%s3673_s6 + $0x160] ss:$16 sps:$4 sm:$0xff]  }
  0xb3   : > { %1960 = vmatpush1.bf16.msra.mxu1 %v2963_v26  ;;  %1920 = vmatprep.subr.bf16.mxu0 %v2964_v27  ;;  %v2996_v48 = vld [vmem:[%s3673_s6 + $0x364] ss:$16 sps:$4 sm:$0xff]   ;;  %v2999_v51 = vld [vmem:[%s3673_s6 + $0x360] ss:$16 sps:$4 sm:$0xff]  }
  0xb4   : > { %1961 = vmatprep.subr.bf16.mxu1 %v2966_v28  ;;  %v3000_v54 = vld [vmem:[%s3673_s6 + $0x184] ss:$16 sps:$4 sm:$0xff]   ;;  %v3004_v57 = vld [vmem:[%s3673_s6 + $0x180] ss:$16 sps:$4 sm:$0xff]  }
  0xb5   : > { %v3002_v56 = vld [vmem:[%s3673_s6 + $0x384] ss:$16 sps:$4 sm:$0xff]   ;;  %v3005_v58 = vld [vmem:[%s3673_s6 + $0x380] ss:$16 sps:$4 sm:$0xff]  }
  0xb6   : > { %1921 = vmatpush1.bf16.msra.mxu0 %v2968_v29  ;;  %v3006_v59 = vld [vmem:[%s3673_s6 + $0x1a4] ss:$16 sps:$4 sm:$0xff]   ;;  %v3010_v61 = vld [vmem:[%s3673_s6 + $0x1a0] ss:$16 sps:$4 sm:$0xff]  }
  0xb7   : > { %1962 = vmatpush1.bf16.msra.mxu1 %v2969_v30  ;;  %1922 = vmatprep.subr.bf16.mxu0 %v2970_v31  ;;  %v3008_v60 = vld [vmem:[%s3673_s6 + $0x3a4] ss:$16 sps:$4 sm:$0xff]   ;;  %v3011_v62 = vld [vmem:[%s3673_s6 + $0x3a0] ss:$16 sps:$4 sm:$0xff]  }
  0xb8   : > { %1963 = vmatprep.subr.bf16.mxu1 %v2972_v32  ;;  %v3012_v63 = vld [vmem:[%s3673_s6 + $0x1c4] ss:$16 sps:$4 sm:$0xff]   ;;  %v3016_v1 = vld [vmem:[%s3673_s6 + $0x1c0] ss:$16 sps:$4 sm:$0xff]  }
  0xb9   : > { %v3014_v0 = vld [vmem:[%s3673_s6 + $0x3c4] ss:$16 sps:$4 sm:$0xff]   ;;  %v3017_v2 = vld [vmem:[%s3673_s6 + $0x3c0] ss:$16 sps:$4 sm:$0xff]  }
  0xba   : > { %1923 = vmatpush1.bf16.msra.mxu0 %v2974_v33  ;;  %v3018_v3 = vld [vmem:[%s3673_s6 + $0x1e4] ss:$16 sps:$4 sm:$0xff]   ;;  %v3022_v5 = vld [vmem:[%s3673_s6 + $0x1e0] ss:$16 sps:$4 sm:$0xff]  }
  0xbb   : > { %1964 = vmatpush1.bf16.msra.mxu1 %v2975_v34  ;;  %1924 = vmatprep.subr.bf16.mxu0 %v2976_v35  ;;  %v3020_v4 = vld [vmem:[%s3673_s6 + $0x3e4] ss:$16 sps:$4 sm:$0xff]   ;;  %v3023_v6 = vld [vmem:[%s3673_s6 + $0x3e0] ss:$16 sps:$4 sm:$0xff]  }
  0xbc   : > { %1965 = vmatprep.subr.bf16.mxu1 %v2978_v36  ;;  %v352_v7 = vld [vmem:[%s3750_s23] sm:$0xff]  ;;  %v354_v8 = vld [vmem:[%s3750_s23 + $0x10] sm:$0xff] }
  0xbd   : > { %v3026_v9 = vld [vmem:[%s3673_s6 + $0x404] ss:$16 sps:$4 sm:$0xff]   ;;  %v3782_v11 = vpack.c.bf16 %v352_v7, %v352_v7  ;;  %v3784_v12 = vpack.c.bf16 %v354_v8, %v354_v8  ;;  %v3024_v13 = vld [vmem:[%s3673_s6 + $0x400] ss:$16 sps:$4 sm:$0xff]  }
  0xbe   : > { %1925 = vmatpush1.bf16.msra.mxu0 %v2980_v37  ;;  %v3029_v10 = vld [vmem:[%s3673_s6 + $0x604] ss:$16 sps:$4 sm:$0xff]   ;;  %v3027_v14 = vld [vmem:[%s3673_s6 + $0x600] ss:$16 sps:$4 sm:$0xff]   ;;  %v357_v37 = vld [vmem:[%s3750_s23 + $0x28] sm:$0xff] }
  0xbf   : > { %1966 = vmatpush1.bf16.msra.mxu1 %v2981_v38  ;;  %1926 = vmatprep.subr.bf16.mxu0 %v2982_v39  ;;  %v3032_v15 = vld [vmem:[%s3673_s6 + $0x424] ss:$16 sps:$4 sm:$0xff]   ;;  %v3030_v17 = vld [vmem:[%s3673_s6 + $0x420] ss:$16 sps:$4 sm:$0xff]  }
  0xc0   : > { %1967 = vmatprep.subr.bf16.mxu1 %v2984_v40  ;;  %v3035_v16 = vld [vmem:[%s3673_s6 + $0x624] ss:$16 sps:$4 sm:$0xff]   ;;  %v3033_v18 = vld [vmem:[%s3673_s6 + $0x620] ss:$16 sps:$4 sm:$0xff]   ;;  %v3815_v40 = vpack.c.bf16 %v357_v37, %v357_v37  ;;  %v3138_v37 = vld [vmem:[%s3673_s6 + $0x68] ss:$16 sps:$4 sm:$0xff]  }
  0xc1   : > { %v3038_v19 = vld [vmem:[%s3673_s6 + $0x444] ss:$16 sps:$4 sm:$0xff]   ;;  %v3036_v21 = vld [vmem:[%s3673_s6 + $0x440] ss:$16 sps:$4 sm:$0xff]  }
  0xc2   : > { %1927 = vmatpush1.bf16.msra.mxu0 %v2986_v41  ;;  %v3041_v20 = vld [vmem:[%s3673_s6 + $0x644] ss:$16 sps:$4 sm:$0xff]   ;;  %v3039_v22 = vld [vmem:[%s3673_s6 + $0x640] ss:$16 sps:$4 sm:$0xff]   ;;  %v359_v41 = vld [vmem:[%s3750_s23 + $0x38] sm:$0xff] }
  0xc3   : > { %1968 = vmatpush1.bf16.msra.mxu1 %v2987_v42  ;;  %1928 = vmatprep.subr.bf16.mxu0 %v2988_v43  ;;  %v3044_v23 = vld [vmem:[%s3673_s6 + $0x464] ss:$16 sps:$4 sm:$0xff]   ;;  %v3042_v25 = vld [vmem:[%s3673_s6 + $0x460] ss:$16 sps:$4 sm:$0xff]   ;;  %v3819_v43 = vpack.c.bf16 %v359_v41, %v359_v41  ;;  %v3147_v41 = vld [vmem:[%s3673_s6 + $0x288] ss:$16 sps:$4 sm:$0xff]  }
  0xc4   : > { %1969 = vmatprep.subr.bf16.mxu1 %v2990_v44  ;;  %v3047_v24 = vld [vmem:[%s3673_s6 + $0x664] ss:$16 sps:$4 sm:$0xff]   ;;  %v3045_v26 = vld [vmem:[%s3673_s6 + $0x660] ss:$16 sps:$4 sm:$0xff]  }
  0xc5   : > { %v3050_v27 = vld [vmem:[%s3673_s6 + $0x484] ss:$16 sps:$4 sm:$0xff]   ;;  %v3048_v29 = vld [vmem:[%s3673_s6 + $0x480] ss:$16 sps:$4 sm:$0xff]  }
  0xc6   : > { %1929 = vmatpush1.bf16.msra.mxu0 %v2992_v45  ;;  %v3053_v28 = vld [vmem:[%s3673_s6 + $0x684] ss:$16 sps:$4 sm:$0xff]   ;;  %v3051_v30 = vld [vmem:[%s3673_s6 + $0x680] ss:$16 sps:$4 sm:$0xff]  }
  0xc7   : > { %1970 = vmatpush1.bf16.msra.mxu1 %v2993_v46  ;;  %1930 = vmatprep.subr.bf16.mxu0 %v2994_v47  ;;  %v3056_v31 = vld [vmem:[%s3673_s6 + $0x4a4] ss:$16 sps:$4 sm:$0xff]   ;;  %v3054_v33 = vld [vmem:[%s3673_s6 + $0x4a0] ss:$16 sps:$4 sm:$0xff]  }
  0xc8   : > { %1971 = vmatprep.subr.bf16.mxu1 %v2996_v48  ;;  %v3059_v32 = vld [vmem:[%s3673_s6 + $0x6a4] ss:$16 sps:$4 sm:$0xff]   ;;  %v3057_v34 = vld [vmem:[%s3673_s6 + $0x6a0] ss:$16 sps:$4 sm:$0xff]  }
  0xc9   : > { %v3062_v35 = vld [vmem:[%s3673_s6 + $0x4c4] ss:$16 sps:$4 sm:$0xff]   ;;  %v3060_v38 = vld [vmem:[%s3673_s6 + $0x4c0] ss:$16 sps:$4 sm:$0xff]  }
  0xca   : > { %1931 = vmatpush1.bf16.msra.mxu0 %v2998_v50  ;;  %v3065_v36 = vld [vmem:[%s3673_s6 + $0x6c4] ss:$16 sps:$4 sm:$0xff]   ;;  %v3063_v39 = vld [vmem:[%s3673_s6 + $0x6c0] ss:$16 sps:$4 sm:$0xff]  }
  0xcb   : > { %1972 = vmatpush1.bf16.msra.mxu1 %v2999_v51  ;;  %1932 = vmatprep.subr.bf16.mxu0 %v3000_v54  ;;  %v3068_v42 = vld [vmem:[%s3673_s6 + $0x4e4] ss:$16 sps:$4 sm:$0xff]   ;;  %v3066_v45 = vld [vmem:[%s3673_s6 + $0x4e0] ss:$16 sps:$4 sm:$0xff]  }
  0xcc   : > { %1973 = vmatprep.subr.bf16.mxu1 %v3002_v56  ;;  %v3071_v44 = vld [vmem:[%s3673_s6 + $0x6e4] ss:$16 sps:$4 sm:$0xff]   ;;  %v3069_v46 = vld [vmem:[%s3673_s6 + $0x6e0] ss:$16 sps:$4 sm:$0xff]  }
  0xcd   : > { %v3074_v47 = vld [vmem:[%s3673_s6 + $0x504] ss:$16 sps:$4 sm:$0xff]   ;;  %v3072_v49 = vld [vmem:[%s3673_s6 + $0x500] ss:$16 sps:$4 sm:$0xff]  }
  0xce   : > { %1933 = vmatpush1.bf16.msra.mxu0 %v3004_v57  ;;  %v3077_v48 = vld [vmem:[%s3673_s6 + $0x704] ss:$16 sps:$4 sm:$0xff]   ;;  %v3075_v50 = vld [vmem:[%s3673_s6 + $0x700] ss:$16 sps:$4 sm:$0xff]  }
  0xcf   : > { %1974 = vmatpush1.bf16.msra.mxu1 %v3005_v58  ;;  %1934 = vmatprep.subr.bf16.mxu0 %v3006_v59  ;;  %v3080_v51 = vld [vmem:[%s3673_s6 + $0x524] ss:$16 sps:$4 sm:$0xff]   ;;  %v3078_v54 = vld [vmem:[%s3673_s6 + $0x520] ss:$16 sps:$4 sm:$0xff]  }
  0xd0   : > { %1975 = vmatprep.subr.bf16.mxu1 %v3008_v60  ;;  %v3083_v53 = vld [vmem:[%s3673_s6 + $0x724] ss:$16 sps:$4 sm:$0xff]   ;;  %v3081_v56 = vld [vmem:[%s3673_s6 + $0x720] ss:$16 sps:$4 sm:$0xff]  }
  0xd1   : > { %v3086_v57 = vld [vmem:[%s3673_s6 + $0x544] ss:$16 sps:$4 sm:$0xff]   ;;  %v3084_v59 = vld [vmem:[%s3673_s6 + $0x540] ss:$16 sps:$4 sm:$0xff]  }
  0xd2   : > { %1935 = vmatpush1.bf16.msra.mxu0 %v3010_v61  ;;  %v3089_v58 = vld [vmem:[%s3673_s6 + $0x744] ss:$16 sps:$4 sm:$0xff]   ;;  %v3087_v60 = vld [vmem:[%s3673_s6 + $0x740] ss:$16 sps:$4 sm:$0xff]  }
  0xd3   : > { %1976 = vmatpush1.bf16.msra.mxu1 %v3011_v62  ;;  %1936 = vmatprep.subr.bf16.mxu0 %v3012_v63  ;;  %v3092_v61 = vld [vmem:[%s3673_s6 + $0x564] ss:$16 sps:$4 sm:$0xff]   ;;  %v3090_v63 = vld [vmem:[%s3673_s6 + $0x560] ss:$16 sps:$4 sm:$0xff]  }
  0xd4   : > { %1977 = vmatprep.subr.bf16.mxu1 %v3014_v0  ;;  %v3095_v62 = vld [vmem:[%s3673_s6 + $0x764] ss:$16 sps:$4 sm:$0xff]   ;;  %v3093_v0 = vld [vmem:[%s3673_s6 + $0x760] ss:$16 sps:$4 sm:$0xff]  }
  0xd5   : > { %v3102_v7 = vld [vmem:[%s3673_s6 + $0x5a0] ss:$16 sps:$4 sm:$0xff]  }
  0xd6   : > { %1937 = vmatpush1.bf16.msra.mxu0 %v3016_v1  ;;  %v3098_v1 = vld [vmem:[%s3673_s6 + $0x584] ss:$16 sps:$4 sm:$0xff]   ;;  %v3105_v8 = vld [vmem:[%s3673_s6 + $0x7a0] ss:$16 sps:$4 sm:$0xff]  }
  0xd7   : > { %1978 = vmatpush1.bf16.msra.mxu1 %v3017_v2  ;;  %1938 = vmatprep.subr.bf16.mxu0 %v3018_v3  ;;  %v3101_v2 = vld [vmem:[%s3673_s6 + $0x784] ss:$16 sps:$4 sm:$0xff]   ;;  %v3096_v3 = vld [vmem:[%s3673_s6 + $0x580] ss:$16 sps:$4 sm:$0xff]  }
  0xd8   : > { %1979 = vmatprep.subr.bf16.mxu1 %v3020_v4  ;;  %v3099_v4 = vld [vmem:[%s3673_s6 + $0x780] ss:$16 sps:$4 sm:$0xff]  }
  0xda   : > { %1939 = vmatpush1.bf16.msra.mxu0 %v3022_v5  ;;  %v3104_v5 = vld [vmem:[%s3673_s6 + $0x5a4] ss:$16 sps:$4 sm:$0xff]  }
  0xdb   : > { %1980 = vmatpush1.bf16.msra.mxu1 %v3023_v6  ;;  %1990 = vmatprep.subr.bf16.mxu0 %v3026_v9  ;;  %v3107_v6 = vld [vmem:[%s3673_s6 + $0x7a4] ss:$16 sps:$4 sm:$0xff]  }
  0xdc   : > { %2031 = vmatprep.subr.bf16.mxu1 %v3029_v10  ;;  %v3110_v9 = vld [vmem:[%s3673_s6 + $0x5c4] ss:$16 sps:$4 sm:$0xff]  }
  0xdd   : > { %1941 = vmatmul.mubr.bf16.vlgmr.msra.gmra.mrb[0].mxu0 %v3782_v11  ;;  %v3113_v10 = vld [vmem:[%s3673_s6 + $0x7c4] ss:$16 sps:$4 sm:$0xff]  }
  0xde   : > { %1982 = vmatmul.mubr.bf16.vlgmr.msra.gmra.mrb[0].mxu1 %v3784_v12  ;;  %1991 = vmatpush1.bf16.msra.mxu0 %v3024_v13  ;;  %v3108_v13 = vld [vmem:[%s3673_s6 + $0x5c0] ss:$16 sps:$4 sm:$0xff]  }
  0xdf   : > { %2032 = vmatpush1.bf16.msra.mxu1 %v3027_v14  ;;  %1992 = vmatprep.subr.bf16.mxu0 %v3032_v15  ;;  %v3111_v14 = vld [vmem:[%s3673_s6 + $0x7c0] ss:$16 sps:$4 sm:$0xff]   ;;  %v3116_v15 = vld [vmem:[%s3673_s6 + $0x5e4] ss:$16 sps:$4 sm:$0xff]  }
  0xe0   : > { %2033 = vmatprep.subr.bf16.mxu1 %v3035_v16  ;;  %2022 = vmatprep.mubr.bf16.mxu0 %v3815_v40  ;;  %v3119_v16 = vld [vmem:[%s3673_s6 + $0x7e4] ss:$16 sps:$4 sm:$0xff]  }
  0xe1   : > { %2063 = vmatprep.mubr.bf16.mxu1 %v3819_v43 }
  0xe2   : > { %1993 = vmatpush1.bf16.msra.mxu0 %v3030_v17  ;;  %v3114_v17 = vld [vmem:[%s3673_s6 + $0x5e0] ss:$16 sps:$4 sm:$0xff]  }
  0xe3   : > { %2034 = vmatpush1.bf16.msra.mxu1 %v3033_v18  ;;  %1994 = vmatprep.subr.bf16.mxu0 %v3038_v19  ;;  %v3117_v18 = vld [vmem:[%s3673_s6 + $0x7e0] ss:$16 sps:$4 sm:$0xff]  }
  0xe4   : > { %2035 = vmatprep.subr.bf16.mxu1 %v3041_v20  ;;  %v356_v19 = vld [vmem:[%s3750_s23 + $0x20] sm:$0xff]  ;;  %v358_v20 = vld [vmem:[%s3750_s23 + $0x30] sm:$0xff] }
  0xe6   : > { %1995 = vmatpush1.bf16.msra.mxu0 %v3036_v21  ;;  %v3122_v21 = vld [vmem:[%s3673_s6 + $0xc] ss:$16 sps:$4 sm:$0xff]  }
  0xe7   : > { %2036 = vmatpush1.bf16.msra.mxu1 %v3039_v22  ;;  %1996 = vmatprep.subr.bf16.mxu0 %v3044_v23  ;;  %v3125_v22 = vld [vmem:[%s3673_s6 + $0x20c] ss:$16 sps:$4 sm:$0xff]   ;;  %v3862_v23 = vpack.c.bf16 %v356_v19, %v356_v19 }
  0xe8   : > { %2037 = vmatprep.subr.bf16.mxu1 %v3047_v24  ;;  %v3864_v24 = vpack.c.bf16 %v358_v20, %v358_v20  ;;  %v3206_v19 = vld [vmem:[%s3673_s6 + $0x1cc] ss:$16 sps:$4 sm:$0xff]  }
  0xe9   : > { %v3209_v20 = vld [vmem:[%s3673_s6 + $0x3cc] ss:$16 sps:$4 sm:$0xff]  }
  0xea   : > { %1997 = vmatpush1.bf16.msra.mxu0 %v3042_v25  ;;  %v3120_v25 = vld [vmem:[%s3673_s6 + $0x8] ss:$16 sps:$4 sm:$0xff]  }
  0xeb   : > { %2038 = vmatpush1.bf16.msra.mxu1 %v3045_v26  ;;  %1998 = vmatprep.subr.bf16.mxu0 %v3050_v27  ;;  %v3123_v26 = vld [vmem:[%s3673_s6 + $0x208] ss:$16 sps:$4 sm:$0xff]   ;;  %v3128_v27 = vld [vmem:[%s3673_s6 + $0x2c] ss:$16 sps:$4 sm:$0xff]  }
  0xec   : > { %2039 = vmatprep.subr.bf16.mxu1 %v3053_v28  ;;  %v3131_v28 = vld [vmem:[%s3673_s6 + $0x22c] ss:$16 sps:$4 sm:$0xff]  }
  0xee   : > { %1999 = vmatpush1.bf16.msra.mxu0 %v3048_v29  ;;  %v3126_v29 = vld [vmem:[%s3673_s6 + $0x28] ss:$16 sps:$4 sm:$0xff]  }
  0xef   : > { %2040 = vmatpush1.bf16.msra.mxu1 %v3051_v30  ;;  %2000 = vmatprep.subr.bf16.mxu0 %v3056_v31  ;;  %v3129_v30 = vld [vmem:[%s3673_s6 + $0x228] ss:$16 sps:$4 sm:$0xff]   ;;  %v3134_v31 = vld [vmem:[%s3673_s6 + $0x4c] ss:$16 sps:$4 sm:$0xff]  }
  0xf0   : > { %2041 = vmatprep.subr.bf16.mxu1 %v3059_v32  ;;  %v3137_v32 = vld [vmem:[%s3673_s6 + $0x24c] ss:$16 sps:$4 sm:$0xff]  }
  0xf2   : > { %2001 = vmatpush1.bf16.msra.mxu0 %v3054_v33  ;;  %v3132_v33 = vld [vmem:[%s3673_s6 + $0x48] ss:$16 sps:$4 sm:$0xff]  }
  0xf3   : > { %2042 = vmatpush1.bf16.msra.mxu1 %v3057_v34  ;;  %2002 = vmatprep.subr.bf16.mxu0 %v3062_v35  ;;  %v3135_v34 = vld [vmem:[%s3673_s6 + $0x248] ss:$16 sps:$4 sm:$0xff]   ;;  %v3140_v35 = vld [vmem:[%s3673_s6 + $0x6c] ss:$16 sps:$4 sm:$0xff]  }
  0xf4   : > { %2043 = vmatprep.subr.bf16.mxu1 %v3065_v36  ;;  %v3143_v36 = vld [vmem:[%s3673_s6 + $0x26c] ss:$16 sps:$4 sm:$0xff]  }
  0xf6   : > { %2003 = vmatpush1.bf16.msra.mxu0 %v3060_v38  ;;  %v3141_v38 = vld [vmem:[%s3673_s6 + $0x268] ss:$16 sps:$4 sm:$0xff]  }
  0xf7   : > { %2044 = vmatpush1.bf16.msra.mxu1 %v3063_v39  ;;  %2004 = vmatprep.subr.bf16.mxu0 %v3068_v42  ;;  %v3144_v39 = vld [vmem:[%s3673_s6 + $0x88] ss:$16 sps:$4 sm:$0xff]   ;;  %v3152_v42 = vld [vmem:[%s3673_s6 + $0xac] ss:$16 sps:$4 sm:$0xff]  }
  0xf8   : > { %2045 = vmatprep.subr.bf16.mxu1 %v3071_v44  ;;  %v3155_v44 = vld [vmem:[%s3673_s6 + $0x2ac] ss:$16 sps:$4 sm:$0xff]  }
  0xfa   : > { %2005 = vmatpush1.bf16.msra.mxu0 %v3066_v45  ;;  %v3150_v45 = vld [vmem:[%s3673_s6 + $0xa8] ss:$16 sps:$4 sm:$0xff]  }
  0xfb   : > { %2046 = vmatpush1.bf16.msra.mxu1 %v3069_v46  ;;  %2006 = vmatprep.subr.bf16.mxu0 %v3074_v47  ;;  %v3153_v46 = vld [vmem:[%s3673_s6 + $0x2a8] ss:$16 sps:$4 sm:$0xff]   ;;  %v3158_v47 = vld [vmem:[%s3673_s6 + $0xcc] ss:$16 sps:$4 sm:$0xff]  }
  0xfc   : > { %2047 = vmatprep.subr.bf16.mxu1 %v3077_v48  ;;  %v3161_v48 = vld [vmem:[%s3673_s6 + $0x2cc] ss:$16 sps:$4 sm:$0xff]  }
  0xfe   : > { %2007 = vmatpush1.bf16.msra.mxu0 %v3072_v49  ;;  %v3156_v49 = vld [vmem:[%s3673_s6 + $0xc8] ss:$16 sps:$4 sm:$0xff]  }
  0xff   : > { %2048 = vmatpush1.bf16.msra.mxu1 %v3075_v50  ;;  %2008 = vmatprep.subr.bf16.mxu0 %v3080_v51  ;;  %v3159_v50 = vld [vmem:[%s3673_s6 + $0x2c8] ss:$16 sps:$4 sm:$0xff]   ;;  %v3164_v51 = vld [vmem:[%s3673_s6 + $0xec] ss:$16 sps:$4 sm:$0xff]  }
 0x100   : > { %2049 = vmatprep.subr.bf16.mxu1 %v3083_v53  ;;  %v3167_v53 = vld [vmem:[%s3673_s6 + $0x2ec] ss:$16 sps:$4 sm:$0xff]  }
 0x102   : > { %2009 = vmatpush1.bf16.msra.mxu0 %v3078_v54  ;;  %v3162_v54 = vld [vmem:[%s3673_s6 + $0xe8] ss:$16 sps:$4 sm:$0xff]  }
 0x103   : > { %2050 = vmatpush1.bf16.msra.mxu1 %v3081_v56  ;;  %2010 = vmatprep.subr.bf16.mxu0 %v3086_v57  ;;  %v3165_v56 = vld [vmem:[%s3673_s6 + $0x2e8] ss:$16 sps:$4 sm:$0xff]   ;;  %v3170_v57 = vld [vmem:[%s3673_s6 + $0x10c] ss:$16 sps:$4 sm:$0xff]  }
 0x104   : > { %2051 = vmatprep.subr.bf16.mxu1 %v3089_v58  ;;  %v3173_v58 = vld [vmem:[%s3673_s6 + $0x30c] ss:$16 sps:$4 sm:$0xff]  }
 0x106   : > { %2011 = vmatpush1.bf16.msra.mxu0 %v3084_v59  ;;  %v3168_v59 = vld [vmem:[%s3673_s6 + $0x108] ss:$16 sps:$4 sm:$0xff]  }
 0x107   : > { %2052 = vmatpush1.bf16.msra.mxu1 %v3087_v60  ;;  %2012 = vmatprep.subr.bf16.mxu0 %v3092_v61  ;;  %v3171_v60 = vld [vmem:[%s3673_s6 + $0x308] ss:$16 sps:$4 sm:$0xff]   ;;  %v3176_v61 = vld [vmem:[%s3673_s6 + $0x12c] ss:$16 sps:$4 sm:$0xff]  }
 0x108   : > { %2053 = vmatprep.subr.bf16.mxu1 %v3095_v62  ;;  %v3179_v62 = vld [vmem:[%s3673_s6 + $0x32c] ss:$16 sps:$4 sm:$0xff]  }
 0x10a   : > { %2013 = vmatpush1.bf16.msra.mxu0 %v3090_v63  ;;  %v3174_v63 = vld [vmem:[%s3673_s6 + $0x128] ss:$16 sps:$4 sm:$0xff]  }
 0x10b   : > { %2054 = vmatpush1.bf16.msra.mxu1 %v3093_v0  ;;  %2014 = vmatprep.subr.bf16.mxu0 %v3098_v1  ;;  %v3177_v0 = vld [vmem:[%s3673_s6 + $0x328] ss:$16 sps:$4 sm:$0xff]   ;;  %v3182_v1 = vld [vmem:[%s3673_s6 + $0x14c] ss:$16 sps:$4 sm:$0xff]  }
 0x10c   : > { %2055 = vmatprep.subr.bf16.mxu1 %v3101_v2  ;;  %v3185_v2 = vld [vmem:[%s3673_s6 + $0x34c] ss:$16 sps:$4 sm:$0xff]  }
 0x10e   : > { %2015 = vmatpush1.bf16.msra.mxu0 %v3096_v3  ;;  %v3180_v3 = vld [vmem:[%s3673_s6 + $0x148] ss:$16 sps:$4 sm:$0xff]  }
 0x10f   : > { %2056 = vmatpush1.bf16.msra.mxu1 %v3099_v4  ;;  %2016 = vmatprep.subr.bf16.mxu0 %v3104_v5  ;;  %v3183_v4 = vld [vmem:[%s3673_s6 + $0x348] ss:$16 sps:$4 sm:$0xff]   ;;  %v3188_v5 = vld [vmem:[%s3673_s6 + $0x16c] ss:$16 sps:$4 sm:$0xff]  }
 0x110   : > { %2057 = vmatprep.subr.bf16.mxu1 %v3107_v6  ;;  %v3191_v6 = vld [vmem:[%s3673_s6 + $0x36c] ss:$16 sps:$4 sm:$0xff]  }
 0x112   : > { %2017 = vmatpush1.bf16.msra.mxu0 %v3102_v7  ;;  %v3186_v7 = vld [vmem:[%s3673_s6 + $0x168] ss:$16 sps:$4 sm:$0xff]  }
 0x113   : > { %2058 = vmatpush1.bf16.msra.mxu1 %v3105_v8  ;;  %2018 = vmatprep.subr.bf16.mxu0 %v3110_v9  ;;  %v3189_v8 = vld [vmem:[%s3673_s6 + $0x368] ss:$16 sps:$4 sm:$0xff]   ;;  %v3194_v9 = vld [vmem:[%s3673_s6 + $0x18c] ss:$16 sps:$4 sm:$0xff]  }
 0x114   : > { %2059 = vmatprep.subr.bf16.mxu1 %v3113_v10  ;;  %v3197_v10 = vld [vmem:[%s3673_s6 + $0x38c] ss:$16 sps:$4 sm:$0xff]  }
 0x116   : > { %2019 = vmatpush1.bf16.msra.mxu0 %v3108_v13  ;;  %v3192_v13 = vld [vmem:[%s3673_s6 + $0x188] ss:$16 sps:$4 sm:$0xff]  }
 0x117   : > { %2060 = vmatpush1.bf16.msra.mxu1 %v3111_v14  ;;  %2020 = vmatprep.subr.bf16.mxu0 %v3116_v15  ;;  %v3195_v14 = vld [vmem:[%s3673_s6 + $0x388] ss:$16 sps:$4 sm:$0xff]   ;;  %v3200_v15 = vld [vmem:[%s3673_s6 + $0x1ac] ss:$16 sps:$4 sm:$0xff]  }
 0x118   : > { %2061 = vmatprep.subr.bf16.mxu1 %v3119_v16  ;;  %v3203_v16 = vld [vmem:[%s3673_s6 + $0x3ac] ss:$16 sps:$4 sm:$0xff]  }
 0x11a   : > { %2021 = vmatpush1.bf16.msra.mxu0 %v3114_v17  ;;  %v3198_v17 = vld [vmem:[%s3673_s6 + $0x1a8] ss:$16 sps:$4 sm:$0xff]  }
 0x11b   : > { %2062 = vmatpush1.bf16.msra.mxu1 %v3117_v18  ;;  %2072 = vmatprep.subr.bf16.mxu0 %v3122_v21  ;;  %v3201_v18 = vld [vmem:[%s3673_s6 + $0x3a8] ss:$16 sps:$4 sm:$0xff]  }
 0x11c   : > { %2113 = vmatprep.subr.bf16.mxu1 %v3125_v22  ;;  %v3204_v21 = vld [vmem:[%s3673_s6 + $0x1c8] ss:$16 sps:$4 sm:$0xff]  }
 0x11d   : > { %2023 = vmatmul.mubr.bf16.vlgmr.msra.gmra.mrb[4].mxu0 %v3862_v23  ;;  %v3207_v22 = vld [vmem:[%s3673_s6 + $0x3c8] ss:$16 sps:$4 sm:$0xff]  }
 0x11e   : > { %2064 = vmatmul.mubr.bf16.vlgmr.msra.gmra.mrb[4].mxu1 %v3864_v24  ;;  %2073 = vmatpush1.bf16.msra.mxu0 %v3120_v25  ;;  %v3212_v25 = vld [vmem:[%s3673_s6 + $0x1ec] ss:$16 sps:$4 sm:$0xff]  }
 0x11f   : > { %2114 = vmatpush1.bf16.msra.mxu1 %v3123_v26  ;;  %2074 = vmatprep.subr.bf16.mxu0 %v3128_v27  ;;  %v3215_v26 = vld [vmem:[%s3673_s6 + $0x3ec] ss:$16 sps:$4 sm:$0xff]   ;;  %v3210_v27 = vld [vmem:[%s3673_s6 + $0x1e8] ss:$16 sps:$4 sm:$0xff]  }
 0x120   : > { %2115 = vmatprep.subr.bf16.mxu1 %v3131_v28  ;;  %2104 = vmatprep.mubr.bf16.mxu0 %v3755_v52  ;;  %v3146_v52 = vld [vmem:[%s3673_s6 + $0x8c] ss:$16 sps:$4 sm:$0xff]   ;;  %v3213_v28 = vld [vmem:[%s3673_s6 + $0x3e8] ss:$16 sps:$4 sm:$0xff]  }
 0x121   : > { %2145 = vmatprep.mubr.bf16.mxu1 %v3759_v55  ;;  %v3149_v55 = vld [vmem:[%s3673_s6 + $0x28c] ss:$16 sps:$4 sm:$0xff]  }
 0x122   : > { %2075 = vmatpush1.bf16.msra.mxu0 %v3126_v29  ;;  %v3218_v29 = vld [vmem:[%s3673_s6 + $0x40c] ss:$16 sps:$4 sm:$0xff]  }
 0x123   : > { %2116 = vmatpush1.bf16.msra.mxu1 %v3129_v30  ;;  %2076 = vmatprep.subr.bf16.mxu0 %v3134_v31  ;;  %v3221_v30 = vld [vmem:[%s3673_s6 + $0x60c] ss:$16 sps:$4 sm:$0xff]   ;;  %v3216_v31 = vld [vmem:[%s3673_s6 + $0x408] ss:$16 sps:$4 sm:$0xff]  }
 0x124   : > { %2117 = vmatprep.subr.bf16.mxu1 %v3137_v32  ;;  %v3219_v32 = vld [vmem:[%s3673_s6 + $0x608] ss:$16 sps:$4 sm:$0xff]  }
 0x126   : > { %2077 = vmatpush1.bf16.msra.mxu0 %v3132_v33  ;;  %v3224_v33 = vld [vmem:[%s3673_s6 + $0x42c] ss:$16 sps:$4 sm:$0xff]  }
 0x127   : > { %2118 = vmatpush1.bf16.msra.mxu1 %v3135_v34  ;;  %2078 = vmatprep.subr.bf16.mxu0 %v3140_v35  ;;  %v3227_v34 = vld [vmem:[%s3673_s6 + $0x62c] ss:$16 sps:$4 sm:$0xff]   ;;  %v3222_v35 = vld [vmem:[%s3673_s6 + $0x428] ss:$16 sps:$4 sm:$0xff]  }
 0x128   : > { %2119 = vmatprep.subr.bf16.mxu1 %v3143_v36  ;;  %v3225_v36 = vld [vmem:[%s3673_s6 + $0x628] ss:$16 sps:$4 sm:$0xff]  }
 0x12a   : > { %2079 = vmatpush1.bf16.msra.mxu0 %v3138_v37  ;;  %v3230_v37 = vld [vmem:[%s3673_s6 + $0x44c] ss:$16 sps:$4 sm:$0xff]  }
 0x12b   : > { %2120 = vmatpush1.bf16.msra.mxu1 %v3141_v38  ;;  %2080 = vmatprep.subr.bf16.mxu0 %v3146_v52  ;;  %v3233_v38 = vld [vmem:[%s3673_s6 + $0x64c] ss:$16 sps:$4 sm:$0xff]  }
 0x12c   : > { %2121 = vmatprep.subr.bf16.mxu1 %v3149_v55  ;;  %v3236_v52 = vld [vmem:[%s3673_s6 + $0x46c] ss:$16 sps:$4 sm:$0xff]  }
 0x12d   : > { %v3239_v55 = vld [vmem:[%s3673_s6 + $0x66c] ss:$16 sps:$4 sm:$0xff]  }
 0x12e   : > { %2081 = vmatpush1.bf16.msra.mxu0 %v3144_v39  ;;  %v3234_v39 = vld [vmem:[%s3673_s6 + $0x468] ss:$16 sps:$4 sm:$0xff]  }
 0x12f   : > { %2122 = vmatpush1.bf16.msra.mxu1 %v3147_v41  ;;  %2082 = vmatprep.subr.bf16.mxu0 %v3152_v42  ;;  %v3245_v41 = vld [vmem:[%s3673_s6 + $0x68c] ss:$16 sps:$4 sm:$0xff]   ;;  %v3240_v42 = vld [vmem:[%s3673_s6 + $0x488] ss:$16 sps:$4 sm:$0xff]  }
 0x130   : > { %2123 = vmatprep.subr.bf16.mxu1 %v3155_v44  ;;  %v3243_v44 = vld [vmem:[%s3673_s6 + $0x688] ss:$16 sps:$4 sm:$0xff]  }
 0x132   : > { %2083 = vmatpush1.bf16.msra.mxu0 %v3150_v45  ;;  %v3248_v45 = vld [vmem:[%s3673_s6 + $0x4ac] ss:$16 sps:$4 sm:$0xff]  }
 0x133   : > { %2124 = vmatpush1.bf16.msra.mxu1 %v3153_v46  ;;  %2084 = vmatprep.subr.bf16.mxu0 %v3158_v47  ;;  %v3251_v46 = vld [vmem:[%s3673_s6 + $0x6ac] ss:$16 sps:$4 sm:$0xff]   ;;  %v3246_v47 = vld [vmem:[%s3673_s6 + $0x4a8] ss:$16 sps:$4 sm:$0xff]  }
 0x134   : > { %2125 = vmatprep.subr.bf16.mxu1 %v3161_v48  ;;  %v3249_v48 = vld [vmem:[%s3673_s6 + $0x6a8] ss:$16 sps:$4 sm:$0xff]  }
 0x136   : > { %2085 = vmatpush1.bf16.msra.mxu0 %v3156_v49  ;;  %v3254_v49 = vld [vmem:[%s3673_s6 + $0x4cc] ss:$16 sps:$4 sm:$0xff]  }
 0x137   : > { %2126 = vmatpush1.bf16.msra.mxu1 %v3159_v50  ;;  %2086 = vmatprep.subr.bf16.mxu0 %v3164_v51  ;;  %v3257_v50 = vld [vmem:[%s3673_s6 + $0x6cc] ss:$16 sps:$4 sm:$0xff]   ;;  %v3252_v51 = vld [vmem:[%s3673_s6 + $0x4c8] ss:$16 sps:$4 sm:$0xff]  }
 0x138   : > { %2127 = vmatprep.subr.bf16.mxu1 %v3167_v53  ;;  %v3255_v53 = vld [vmem:[%s3673_s6 + $0x6c8] ss:$16 sps:$4 sm:$0xff]  }
 0x13a   : > { %2087 = vmatpush1.bf16.msra.mxu0 %v3162_v54  ;;  %v3260_v54 = vld [vmem:[%s3673_s6 + $0x4ec] ss:$16 sps:$4 sm:$0xff]  }
 0x13b   : > { %2128 = vmatpush1.bf16.msra.mxu1 %v3165_v56  ;;  %2088 = vmatprep.subr.bf16.mxu0 %v3170_v57  ;;  %v3263_v56 = vld [vmem:[%s3673_s6 + $0x6ec] ss:$16 sps:$4 sm:$0xff]   ;;  %v3258_v57 = vld [vmem:[%s3673_s6 + $0x4e8] ss:$16 sps:$4 sm:$0xff]  }
 0x13c   : > { %2129 = vmatprep.subr.bf16.mxu1 %v3173_v58  ;;  %v3261_v58 = vld [vmem:[%s3673_s6 + $0x6e8] ss:$16 sps:$4 sm:$0xff]  }
 0x13e   : > { %2089 = vmatpush1.bf16.msra.mxu0 %v3168_v59  ;;  %v3266_v59 = vld [vmem:[%s3673_s6 + $0x50c] ss:$16 sps:$4 sm:$0xff]  }
 0x13f   : > { %2130 = vmatpush1.bf16.msra.mxu1 %v3171_v60  ;;  %2090 = vmatprep.subr.bf16.mxu0 %v3176_v61  ;;  %v3269_v60 = vld [vmem:[%s3673_s6 + $0x70c] ss:$16 sps:$4 sm:$0xff]   ;;  %v3264_v61 = vld [vmem:[%s3673_s6 + $0x508] ss:$16 sps:$4 sm:$0xff]  }
 0x140   : > { %2131 = vmatprep.subr.bf16.mxu1 %v3179_v62  ;;  %v3267_v62 = vld [vmem:[%s3673_s6 + $0x708] ss:$16 sps:$4 sm:$0xff]  }
 0x142   : > { %2091 = vmatpush1.bf16.msra.mxu0 %v3174_v63  ;;  %v3272_v63 = vld [vmem:[%s3673_s6 + $0x52c] ss:$16 sps:$4 sm:$0xff]  }
 0x143   : > { %2132 = vmatpush1.bf16.msra.mxu1 %v3177_v0  ;;  %2092 = vmatprep.subr.bf16.mxu0 %v3182_v1  ;;  %v3275_v0 = vld [vmem:[%s3673_s6 + $0x72c] ss:$16 sps:$4 sm:$0xff]   ;;  %v3270_v1 = vld [vmem:[%s3673_s6 + $0x528] ss:$16 sps:$4 sm:$0xff]  }
 0x144   : > { %2133 = vmatprep.subr.bf16.mxu1 %v3185_v2  ;;  %v3273_v2 = vld [vmem:[%s3673_s6 + $0x728] ss:$16 sps:$4 sm:$0xff]  }
 0x146   : > { %2093 = vmatpush1.bf16.msra.mxu0 %v3180_v3  ;;  %v3278_v3 = vld [vmem:[%s3673_s6 + $0x54c] ss:$16 sps:$4 sm:$0xff]  }
 0x147   : > { %2134 = vmatpush1.bf16.msra.mxu1 %v3183_v4  ;;  %2094 = vmatprep.subr.bf16.mxu0 %v3188_v5  ;;  %v3281_v4 = vld [vmem:[%s3673_s6 + $0x74c] ss:$16 sps:$4 sm:$0xff]   ;;  %v3276_v5 = vld [vmem:[%s3673_s6 + $0x548] ss:$16 sps:$4 sm:$0xff]  }
 0x148   : > { %2135 = vmatprep.subr.bf16.mxu1 %v3191_v6  ;;  %v3279_v6 = vld [vmem:[%s3673_s6 + $0x748] ss:$16 sps:$4 sm:$0xff]  }
 0x14a   : > { %2095 = vmatpush1.bf16.msra.mxu0 %v3186_v7  ;;  %v3284_v7 = vld [vmem:[%s3673_s6 + $0x56c] ss:$16 sps:$4 sm:$0xff]  }
 0x14b   : > { %2136 = vmatpush1.bf16.msra.mxu1 %v3189_v8  ;;  %2096 = vmatprep.subr.bf16.mxu0 %v3194_v9  ;;  %v3287_v8 = vld [vmem:[%s3673_s6 + $0x76c] ss:$16 sps:$4 sm:$0xff]   ;;  %v3282_v9 = vld [vmem:[%s3673_s6 + $0x568] ss:$16 sps:$4 sm:$0xff]  }
 0x14c   : > { %2137 = vmatprep.subr.bf16.mxu1 %v3197_v10  ;;  %v3285_v10 = vld [vmem:[%s3673_s6 + $0x768] ss:$16 sps:$4 sm:$0xff]  }
 0x14e   : > { %2097 = vmatpush1.bf16.msra.mxu0 %v3192_v13  ;;  %v3290_v13 = vld [vmem:[%s3673_s6 + $0x58c] ss:$16 sps:$4 sm:$0xff]  }
 0x14f   : > { %2138 = vmatpush1.bf16.msra.mxu1 %v3195_v14  ;;  %2098 = vmatprep.subr.bf16.mxu0 %v3200_v15  ;;  %v3293_v14 = vld [vmem:[%s3673_s6 + $0x78c] ss:$16 sps:$4 sm:$0xff]   ;;  %v3288_v15 = vld [vmem:[%s3673_s6 + $0x588] ss:$16 sps:$4 sm:$0xff]  }
 0x150   : > { %2139 = vmatprep.subr.bf16.mxu1 %v3203_v16  ;;  %v3291_v16 = vld [vmem:[%s3673_s6 + $0x788] ss:$16 sps:$4 sm:$0xff]  }
 0x152   : > { %2099 = vmatpush1.bf16.msra.mxu0 %v3198_v17  ;;  %v3296_v17 = vld [vmem:[%s3673_s6 + $0x5ac] ss:$16 sps:$4 sm:$0xff]  }
 0x153   : > { %2140 = vmatpush1.bf16.msra.mxu1 %v3201_v18  ;;  %2100 = vmatprep.subr.bf16.mxu0 %v3206_v19  ;;  %v3299_v18 = vld [vmem:[%s3673_s6 + $0x7ac] ss:$16 sps:$4 sm:$0xff]   ;;  %v3294_v19 = vld [vmem:[%s3673_s6 + $0x5a8] ss:$16 sps:$4 sm:$0xff]  }
 0x154   : > { %2141 = vmatprep.subr.bf16.mxu1 %v3209_v20  ;;  %v3297_v20 = vld [vmem:[%s3673_s6 + $0x7a8] ss:$16 sps:$4 sm:$0xff]  }
 0x156   : > { %2101 = vmatpush1.bf16.msra.mxu0 %v3204_v21  ;;  %v3302_v21 = vld [vmem:[%s3673_s6 + $0x5cc] ss:$16 sps:$4 sm:$0xff]  }
 0x157   : > { %2142 = vmatpush1.bf16.msra.mxu1 %v3207_v22  ;;  %2102 = vmatprep.subr.bf16.mxu0 %v3212_v25  ;;  %v3305_v22 = vld [vmem:[%s3673_s6 + $0x7cc] ss:$16 sps:$4 sm:$0xff]   ;;  %v3300_v25 = vld [vmem:[%s3673_s6 + $0x5c8] ss:$16 sps:$4 sm:$0xff]  }
 0x158   : > { %2143 = vmatprep.subr.bf16.mxu1 %v3215_v26  ;;  %v3303_v26 = vld [vmem:[%s3673_s6 + $0x7c8] ss:$16 sps:$4 sm:$0xff]  }
 0x15a   : > { %2103 = vmatpush1.bf16.msra.mxu0 %v3210_v27  ;;  %v3308_v27 = vld [vmem:[%s3673_s6 + $0x5ec] ss:$16 sps:$4 sm:$0xff]  }
 0x15b   : > { %2144 = vmatpush1.bf16.msra.mxu1 %v3213_v28  ;;  %2154 = vmatprep.subr.bf16.mxu0 %v3218_v29  ;;  %v3311_v28 = vld [vmem:[%s3673_s6 + $0x7ec] ss:$16 sps:$4 sm:$0xff]   ;;  %v3306_v29 = vld [vmem:[%s3673_s6 + $0x5e8] ss:$16 sps:$4 sm:$0xff]  }
 0x15c   : > { %2195 = vmatprep.subr.bf16.mxu1 %v3221_v30  ;;  %v3309_v30 = vld [vmem:[%s3673_s6 + $0x7e8] ss:$16 sps:$4 sm:$0xff]  }
 0x15d   : > { %2105 = vmatmul.mubr.bf16.vlgmr.msra.gmra.mrb[8].mxu0 %v3782_v11  ;;  %v3228_v11 = vld [vmem:[%s3673_s6 + $0x448] ss:$16 sps:$4 sm:$0xff]  }
 0x15e   : > { %2146 = vmatmul.mubr.bf16.vlgmr.msra.gmra.mrb[8].mxu1 %v3784_v12  ;;  %2155 = vmatpush1.bf16.msra.mxu0 %v3216_v31  ;;  %v3231_v12 = vld [vmem:[%s3673_s6 + $0x648] ss:$16 sps:$4 sm:$0xff]  }
 0x15f   : > { %2196 = vmatpush1.bf16.msra.mxu1 %v3219_v32  ;;  %2156 = vmatprep.subr.bf16.mxu0 %v3224_v33 }
 0x160   : > { %2197 = vmatprep.subr.bf16.mxu1 %v3227_v34  ;;  %2186 = vmatprep.mubr.bf16.mxu0 %v3815_v40  ;;  %v3237_v40 = vld [vmem:[%s3673_s6 + $0x668] ss:$16 sps:$4 sm:$0xff]  }
 0x161   : > { %2227 = vmatprep.mubr.bf16.mxu1 %v3819_v43  ;;  %v3242_v43 = vld [vmem:[%s3673_s6 + $0x48c] ss:$16 sps:$4 sm:$0xff]  }
 0x162   : > { %2157 = vmatpush1.bf16.msra.mxu0 %v3222_v35 }
 0x163   : > { %2198 = vmatpush1.bf16.msra.mxu1 %v3225_v36  ;;  %2158 = vmatprep.subr.bf16.mxu0 %v3230_v37 }
 0x164   : > { %2199 = vmatprep.subr.bf16.mxu1 %v3233_v38 }
 0x166   : > { %2159 = vmatpush1.bf16.msra.mxu0 %v3228_v11 }
 0x167   : > { %2200 = vmatpush1.bf16.msra.mxu1 %v3231_v12  ;;  %2160 = vmatprep.subr.bf16.mxu0 %v3236_v52 }
 0x168   : > { %2201 = vmatprep.subr.bf16.mxu1 %v3239_v55 }
 0x16a   : > { %2161 = vmatpush1.bf16.msra.mxu0 %v3234_v39 }
 0x16b   : > { %2202 = vmatpush1.bf16.msra.mxu1 %v3237_v40  ;;  %2162 = vmatprep.subr.bf16.mxu0 %v3242_v43 }
 0x16c   : > { %2203 = vmatprep.subr.bf16.mxu1 %v3245_v41 }
 0x16e   : > { %2163 = vmatpush1.bf16.msra.mxu0 %v3240_v42 }
 0x16f   : > { %2204 = vmatpush1.bf16.msra.mxu1 %v3243_v44  ;;  %2164 = vmatprep.subr.bf16.mxu0 %v3248_v45  ;;  %v369_v45 = vld [vmem:[#allocation2 + $0x8] sm:$0xff] }
 0x170   : > { %2205 = vmatprep.subr.bf16.mxu1 %v3251_v46 }
 0x172   : > { %2165 = vmatpush1.bf16.msra.mxu0 %v3246_v47 }
 0x173   : > { %2206 = vmatpush1.bf16.msra.mxu1 %v3249_v48  ;;  %2166 = vmatprep.subr.bf16.mxu0 %v3254_v49 }
 0x174   : > { %2207 = vmatprep.subr.bf16.mxu1 %v3257_v50 }
 0x176   : > { %2167 = vmatpush1.bf16.msra.mxu0 %v3252_v51 }
 0x177   : > { %2208 = vmatpush1.bf16.msra.mxu1 %v3255_v53  ;;  %2168 = vmatprep.subr.bf16.mxu0 %v3260_v54 }
 0x178   : > { %2209 = vmatprep.subr.bf16.mxu1 %v3263_v56 }
 0x17a   : > { %2169 = vmatpush1.bf16.msra.mxu0 %v3258_v57 }
 0x17b   : > { %2210 = vmatpush1.bf16.msra.mxu1 %v3261_v58  ;;  %2170 = vmatprep.subr.bf16.mxu0 %v3266_v59 }
 0x17c   : > { %2211 = vmatprep.subr.bf16.mxu1 %v3269_v60 }
 0x17e   : > { %2171 = vmatpush1.bf16.msra.mxu0 %v3264_v61 }
 0x17f   : > { %2212 = vmatpush1.bf16.msra.mxu1 %v3267_v62  ;;  %2172 = vmatprep.subr.bf16.mxu0 %v3272_v63 }
 0x180   : > { %2213 = vmatprep.subr.bf16.mxu1 %v3275_v0 }
 0x182   : > { %2173 = vmatpush1.bf16.msra.mxu0 %v3270_v1 }
 0x183   : > { %2214 = vmatpush1.bf16.msra.mxu1 %v3273_v2  ;;  %2174 = vmatprep.subr.bf16.mxu0 %v3278_v3 }
 0x184   : > { %2215 = vmatprep.subr.bf16.mxu1 %v3281_v4  ;;  %v370_v4 = vld [vmem:[#allocation2 + $0x10] sm:$0xff] }
 0x186   : > { %2175 = vmatpush1.bf16.msra.mxu0 %v3276_v5 }
 0x187   : > { %2216 = vmatpush1.bf16.msra.mxu1 %v3279_v6  ;;  %2176 = vmatprep.subr.bf16.mxu0 %v3284_v7 }
 0x188   : > { %2217 = vmatprep.subr.bf16.mxu1 %v3287_v8 }
 0x18a   : > { %2177 = vmatpush1.bf16.msra.mxu0 %v3282_v9  ;;  %v371_v9 = vld [vmem:[#allocation2 + $0x18] sm:$0xff] }
 0x18b   : > { %2218 = vmatpush1.bf16.msra.mxu1 %v3285_v10  ;;  %2178 = vmatprep.subr.bf16.mxu0 %v3290_v13 }
 0x18c   : > { %2219 = vmatprep.subr.bf16.mxu1 %v3293_v14 }
 0x18e   : > { %2179 = vmatpush1.bf16.msra.mxu0 %v3288_v15 }
 0x18f   : > { %2220 = vmatpush1.bf16.msra.mxu1 %v3291_v16  ;;  %2180 = vmatprep.subr.bf16.mxu0 %v3296_v17 }
 0x190   : > { %2221 = vmatprep.subr.bf16.mxu1 %v3299_v18 }
 0x192   : > { %2181 = vmatpush1.bf16.msra.mxu0 %v3294_v19 }
 0x193   : > { %2222 = vmatpush1.bf16.msra.mxu1 %v3297_v20  ;;  %2182 = vmatprep.subr.bf16.mxu0 %v3302_v21 }
 0x194   : > { %2223 = vmatprep.subr.bf16.mxu1 %v3305_v22 }
 0x196   : > { %2183 = vmatpush1.bf16.msra.mxu0 %v3300_v25 }
 0x197   : > { %2224 = vmatpush1.bf16.msra.mxu1 %v3303_v26  ;;  %2184 = vmatprep.subr.bf16.mxu0 %v3308_v27 }
 0x198   : > { %2225 = vmatprep.subr.bf16.mxu1 %v3311_v28 }
 0x19a   : > { %2185 = vmatpush1.bf16.msra.mxu0 %v3306_v29 }
 0x19b   : > { %2226 = vmatpush1.bf16.msra.mxu1 %v3309_v30 }
 0x19d   : > { %2187 = vmatmul.mubr.bf16.vlgmr.msra.gmra.mrb[12].mxu0 %v3862_v23  ;;  %v368_v23 = vld [vmem:[#allocation2] sm:$0xff] }
 0x19e   : > { %2228 = vmatmul.mubr.bf16.vlgmr.msra.gmra.mrb[12].mxu1 %v3864_v24 }
 0x1b0   : > { %v1942_v31 = vpop.f32.mrb[0].mxu0 }
 0x1b1   : > { %v1983_v32 = vpop.f32.mrb[0].mxu1  ;;  %v1944_v34 = vpop.f32.mrb[1].mxu0 }
 0x1b2   : > { %v1984_v33 = vadd.f32 %v1983_v32, %v1942_v31  ;;  %v1985_v35 = vpop.f32.mrb[1].mxu1  ;;  %v1946_v37 = vpop.f32.mrb[2].mxu0 }
 0x1b3   : > { %v1986_v36 = vadd.f32 %v1985_v35, %v1944_v34  ;;  %v1987_v38 = vpop.f32.mrb[2].mxu1  ;;  %v1947_v11 = vpop.f32.mrb[3].mxu0 }
 0x1b4   : > { %v1988_v12 = vpop.f32.mrb[3].mxu1 }
 0x1f0   : > { %v2024_v52 = vpop.f32.mrb[4].mxu0 }
 0x1f1   : > { %v2065_v55 = vpop.f32.mrb[4].mxu1  ;;  %v2025_v39 = vadd.f32 %v2024_v52, %v1984_v33  ;;  %v2026_v40 = vpop.f32.mrb[5].mxu0 }
 0x1f2   : > { %v2067_v43 = vpop.f32.mrb[5].mxu1  ;;  %v2027_v24 = vadd.f32 %v2026_v40, %v1986_v36  ;;  %v2028_v41 = vpop.f32.mrb[6].mxu0 }
 0x1f3   : > { %v2069_v42 = vpop.f32.mrb[6].mxu1  ;;  %v2066_v44 = vadd.f32 %v2065_v55, %v2025_v39  ;;  %v2029_v46 = vpop.f32.mrb[7].mxu0 }
 0x1f4   : > { %v2070_v47 = vpop.f32.mrb[7].mxu1  ;;  %v2068_v48 = vadd.f32 %v2067_v43, %v2027_v24 }
 0x1f5   : > { %v2236_v49 = vadd.f32 %v2066_v44, %v368_v23 }
 0x1f6   : > { %v2237_v50 = vadd.f32 %v2068_v48, %v369_v45 }
 0x1f7   : > { %2240 = vst [vmem:[#allocation2] sm:$0xff] %v2236_v49 }
 0x1f8   : > { %2241 = vst [vmem:[#allocation2 + $0x8] sm:$0xff] %v2237_v50 }
 0x1fe   : > { %v4012_v17 = vld [vmem:[#allocation2] sm:$0xff] (!%p4006_p5) }
 0x1ff   : > { %v4014_v18 = vld [vmem:[#allocation2 + $0x8] sm:$0xff] (!%p4006_p5)  ;;  %v2254_v21 = vrot.slane (!%p4006_p5), %v4012_v17, 4 }
 0x200   : > { %v2260_v22 = vrot.slane (!%p4006_p5), %v4014_v18, 4 }
 0x201   : > { %v2255_v27 = vadd.f32 (!%p4006_p5), %v2254_v21, %v4012_v17 }
 0x202   : > { %v2261_v28 = vadd.f32 (!%p4006_p5), %v2260_v22, %v4014_v18 }
 0x203   : > { %v2256_v31 = vrot.slane (!%p4006_p5), %v2255_v27, 2 }
 0x204   : > { %v2262_v32 = vrot.slane (!%p4006_p5), %v2261_v28, 2 }
 0x205   : > { %v2257_v35 = vadd.f32 (!%p4006_p5), %v2256_v31, %v2255_v27  ;;  %v3470_v31 = vmov (!%p4006_p5), 1966171168  }
 0x206   : > { %v2263_v36 = vadd.f32 (!%p4006_p5), %v2262_v32, %v2261_v28  ;;  %v2335_v32 = vunpack.c.l.s4 (!%p4006_p5), %v3470_v31 }
 0x207   : > { %v2258_v11 = vrot.slane (!%p4006_p5), %v2257_v35, 1 }
 0x208   : > { %v2264_v12 = vrot.slane (!%p4006_p5), %v2263_v36, 1 }
 0x209   : > { %v2259_v39 = vadd.f32 (!%p4006_p5), %v2258_v11, %v2257_v35 }
 0x20a   : > { %v2265_v40 = vadd.f32 (!%p4006_p5), %v2264_v12, %v2263_v36 }
 0x20b   : > { %v4028_v24 = vmul.f32 (!%p4006_p5), 0.125, %v2259_v39 }
 0x20c   : > { %v4030_v41 = vmul.f32 (!%p4006_p5), 0.125, %v2265_v40 }
 0x20d   : > { %v2283_v45 = vsub.f32 (!%p4006_p5), %v4012_v17, %v4028_v24 }
 0x20e   : > { %v2284_v46 = vsub.f32 (!%p4006_p5), %v4014_v18, %v4030_v41 }
 0x20f   : > { %v2287_v49 = vmul.f32 (!%p4006_p5), %v2283_v45, %v2283_v45 }
 0x210   : > { %v2288_v50 = vmul.f32 (!%p4006_p5), %v2284_v46, %v2284_v46 }
 0x230   : > { %v2106_v51 = vpop.f32.mrb[8].mxu0 }
 0x231   : > { %v2147_v53 = vpop.f32.mrb[8].mxu1  ;;  %v2108_v56 = vpop.f32.mrb[9].mxu0 }
 0x232   : > { %v2148_v54 = vadd.f32 %v2147_v53, %v2106_v51  ;;  %v2149_v57 = vpop.f32.mrb[9].mxu1  ;;  %v2110_v59 = vpop.f32.mrb[10].mxu0 }
 0x233   : > { %v2150_v58 = vadd.f32 %v2149_v57, %v2108_v56  ;;  %v2151_v60 = vpop.f32.mrb[10].mxu1  ;;  %v2111_v61 = vpop.f32.mrb[11].mxu0  ;;  %v2297_v56 = vrot.slane (!%p4006_p5), %v2288_v50, 4 }
 0x234   : > { %v2152_v62 = vpop.f32.mrb[11].mxu1 }
 0x235   : > { %v2298_v60 = vadd.f32 (!%p4006_p5), %v2297_v56, %v2288_v50 }
 0x270   : > { %v2188_v63 = vpop.f32.mrb[12].mxu0 }
 0x271   : > { %v2229_v0 = vpop.f32.mrb[12].mxu1  ;;  %v2189_v1 = vadd.f32 %v2188_v63, %v2148_v54  ;;  %v2190_v2 = vpop.f32.mrb[13].mxu0  ;;  %v2291_v54 = vrot.slane (!%p4006_p5), %v2287_v49, 4 }
 0x272   : > { %v2231_v3 = vpop.f32.mrb[13].mxu1  ;;  %v2191_v5 = vadd.f32 %v2190_v2, %v2150_v58  ;;  %v2192_v6 = vpop.f32.mrb[14].mxu0  ;;  %2249 = sbr.rel (%p4006_p5) target bundleno = 717 (0x2cd), region = 60 }
 0x273   : > { %v2233_v7 = vpop.f32.mrb[14].mxu1  ;;  %v2230_v8 = vadd.f32 %v2229_v0, %v2189_v1  ;;  %v2193_v10 = vpop.f32.mrb[15].mxu0  ;;  %v2292_v59 = vadd.f32 (!%p4006_p5), %v2291_v54, %v2287_v49  ;;  %v2299_v0 = vrot.slane (!%p4006_p5), %v2298_v60, 2 }
 0x274   : > { %v2234_v13 = vpop.f32.mrb[15].mxu1  ;;  %v2232_v14 = vadd.f32 %v2231_v3, %v2191_v5 }
 0x275   : > { %v2238_v15 = vadd.f32 %v2230_v8, %v370_v4  ;;  %v2293_v63 = vrot.slane (!%p4006_p5), %v2292_v59, 2  ;;  %v2300_v4 = vadd.f32 (!%p4006_p5), %v2299_v0, %v2298_v60 }
 0x276   : > { %v2239_v16 = vadd.f32 %v2232_v14, %v371_v9 }
 0x277   : > { %2242 = vst [vmem:[#allocation2 + $0x10] sm:$0xff] %v2238_v15  ;;  %v2294_v3 = vadd.f32 (!%p4006_p5), %v2293_v63, %v2292_v59  ;;  %v2301_v8 = vrot.slane (!%p4006_p5), %v2300_v4, 1 }
 0x278   : > { %2243 = vst [vmem:[#allocation2 + $0x18] sm:$0xff] %v2239_v16 }
 0x279   : > { %v2295_v7 = vrot.slane %v2294_v3, 1  ;;  %v2302_v14 = vadd.f32 %v2301_v8, %v2300_v4 }
 0x27b   : > { %v2296_v13 = vadd.f32 %v2295_v7, %v2294_v3  ;;  %v2316_v22 = vmul.f32 0.125, %v2302_v14 }
 0x27d   : > { %v2315_v21 = vmul.f32 0.125, %v2296_v13  ;;  %v2321_v28 = vadd.f32 1e-05, %v2316_v22 }
 0x27e   : > { %v4016_v19 = vld [vmem:[#allocation2 + $0x10] sm:$0xff] }
 0x27f   : > { %v4018_v20 = vld [vmem:[#allocation2 + $0x18] sm:$0xff]  ;;  %v2266_v25 = vrot.slane %v4016_v19, 4  ;;  %v2320_v27 = vadd.f32 1e-05, %v2315_v21 }
 0x280   : > { %v2272_v26 = vrot.slane %v4018_v20, 4 }
 0x281   : > { %v2267_v29 = vadd.f32 %v2266_v25, %v4016_v19  ;;  %3312 = vrsqrt.f32 %v2320_v27 }
 0x282   : > { %v2273_v30 = vadd.f32 %v2272_v26, %v4018_v20  ;;  %3314 = vrsqrt.f32 %v2321_v28 }
 0x283   : > { %v2268_v33 = vrot.slane %v2267_v29, 2 }
 0x284   : > { %v2274_v34 = vrot.slane %v2273_v30, 2 }
 0x285   : > { %v2269_v37 = vadd.f32 %v2268_v33, %v2267_v29  ;;  %v2337_v33 = vlaneseq }
 0x286   : > { %v2275_v38 = vadd.f32 %v2274_v34, %v2273_v30  ;;  %v2336_v34 = vunpack.c.0.s8 %v2335_v32 }
 0x287   : > { %v2270_v52 = vrot.slane %v2269_v37, 1  ;;  %v2338_v35 = vshrl.u32 %v2337_v33, 7 }
 0x288   : > { %v2276_v55 = vrot.slane %v2275_v38, 1 }
 0x289   : > { %v2271_v43 = vadd.f32 %v2270_v52, %v2269_v37  ;;  %v2339_v37 = vsub.s32 %v2336_v34, %v2338_v35  ;;  %v2362_v45 = vsub.s32 0, %v2338_v35  ;;  %v2374_v49 = vsub.s32 3, %v2338_v35 }
 0x28a   : > { %v2277_v23 = vadd.f32 %v2276_v55, %v2275_v38 }
 0x28b   : > { %v4032_v42 = vmul.f32 0.125, %v2271_v43  ;;  %v3313_v36 = vpop.eup %3312 }
 0x28c   : > { %v4034_v44 = vmul.f32 0.125, %v2277_v23  ;;  %v3315_v38 = vpop.eup %3314  ;;  %v2319_v23 = vld [vmem:[%s3680_s25] sm:$0xf]  ;;  %s2447_s25 = sshra.s32 %s3697_s9, 7 }
 0x28d   : > { %v2285_v47 = vsub.f32 %v4016_v19, %v4032_v42  ;;  %v2332_v12 = vcombine.low %v3313_v36, %v3315_v38  ;;  %s2859_s11 = sshll.u32 %s2447_s25, 3 }
 0x28e   : > { %v2286_v48 = vsub.f32 %v4018_v20, %v4034_v44  ;;  %s2450_s26 = scalar_lea.vmem [#allocation3], %s2859_s11 }
 0x28f   : > { %v2289_v51 = vmul.f32 %v2285_v47, %v2285_v47  ;;  %v2340_v39 = vrot.slane %v2332_v12, %v2339_v37  ;;  %v2366_v47 = vsub.s32 1, %v2338_v35 }
 0x290   : > { %v2290_v53 = vmul.f32 %v2286_v48, %v2286_v48  ;;  %v2370_v48 = vsub.s32 2, %v2338_v35 }
 0x291   : > { %v2303_v57 = vrot.slane %v2289_v51, 4 }
 0x292   : > { %v2309_v58 = vrot.slane %v2290_v53, 4 }
 0x293   : > { %v2304_v61 = vadd.f32 %v2303_v57, %v2289_v51 }
 0x294   : > { %v2310_v62 = vadd.f32 %v2309_v58, %v2290_v53 }
 0x295   : > { %v2305_v1 = vrot.slane %v2304_v61, 2 }
 0x296   : > { %v2311_v2 = vrot.slane %v2310_v62, 2 }
 0x297   : > { %v2306_v5 = vadd.f32 %v2305_v1, %v2304_v61 }
 0x298   : > { %v2312_v6 = vadd.f32 %v2311_v2, %v2310_v62  ;;  %v2358_v2 = vld [vmem:[%s3686_s27] sm:$0xf] }
 0x299   : > { %v2307_v9 = vrot.slane %v2306_v5, 1 }
 0x29a   : > { %v2313_v10 = vrot.slane %v2312_v6, 1 }
 0x29b   : > { %v2308_v15 = vadd.f32 %v2307_v9, %v2306_v5 }
 0x29c   : > { %v2314_v16 = vadd.f32 %v2313_v10, %v2312_v6 }
 0x29d   : > { %v2317_v25 = vmul.f32 0.125, %v2308_v15 }
 0x29e   : > { %v2318_v26 = vmul.f32 0.125, %v2314_v16 }
 0x29f   : > { %v2322_v29 = vadd.f32 1e-05, %v2317_v25 }
 0x2a0   : > { %v2323_v30 = vadd.f32 1e-05, %v2318_v26 }
 0x2a1   : > { %3316 = vrsqrt.f32 %v2322_v29 }
 0x2a2   : > { %3318 = vrsqrt.f32 %v2323_v30 }
 0x2ab   : > { %v3317_v11 = vpop.eup %3316 }
 0x2ac   : > { %v3319_v52 = vpop.eup %3318 }
 0x2ad   : > { %v2333_v55 = vcombine.low %v3317_v11, %v3319_v52 }
 0x2af   : > { %v2347_v40 = vrot.slane %v2333_v55, %v2339_v37 }
 0x2b1   : > { %v2348_v43 = vcombine.low %v2340_v39, %v2347_v40 }
 0x2b3   : > { %v2355_v46 = vrot.slane %v2348_v43, %v2339_v37 }
 0x2b5   : > { %v2357_v50 = vmul.f32 %v2355_v46, %v2319_v23 }
 0x2b7   : > { %v2363_v51 = vrot.slane %v2357_v50, %v2362_v45  ;;  %v2367_v53 = vrot.slane %v2357_v50, %v2366_v47  ;;  %v2371_v54 = vrot.slane %v2357_v50, %v2370_v48  ;;  %v2375_v56 = vrot.slane %v2357_v50, %v2374_v49 }
 0x2b9   : > { %v2380_v57 = vmul.f32 %v2363_v51, %v4028_v24  ;;  %v2381_v58 = vmul.f32 %v2367_v53, %v4030_v41  ;;  %v2382_v59 = vmul.f32 %v2371_v54, %v4032_v42  ;;  %v2383_v60 = vmul.f32 %v2375_v56, %v4034_v44 }
 0x2ba   : > { %v2414_v4 = vmul.f32 %v2363_v51, %v4012_v17  ;;  %v2415_v6 = vmul.f32 %v2367_v53, %v4014_v18  ;;  %v2416_v24 = vmul.f32 %v2371_v54, %v4016_v19  ;;  %v2417_v41 = vmul.f32 %v2375_v56, %v4018_v20 }
 0x2bb   : > { %v2388_v61 = vcombine.low %v2380_v57, %v2381_v58  ;;  %v2389_v62 = vcombine.low %v2382_v59, %v2383_v60 }
 0x2bd   : > { %v2396_v63 = vrot.slane %v2388_v61, %v2339_v37  ;;  %v2403_v0 = vrot.slane %v2389_v62, %v2339_v37 }
 0x2bf   : > { %v2404_v1 = vcombine.low %v2396_v63, %v2403_v0 }
 0x2c1   : > { %v2411_v3 = vrot.slane %v2404_v1, %v2339_v37 }
 0x2c3   : > { %v2413_v5 = vsub.f32 %v2358_v2, %v2411_v3 }
 0x2c5   : > { %v2422_v42 = vrot.slane %v2413_v5, %v2362_v45  ;;  %v2426_v44 = vrot.slane %v2413_v5, %v2366_v47  ;;  %v2430_v7 = vrot.slane %v2413_v5, %v2370_v48  ;;  %v2434_v8 = vrot.slane %v2413_v5, %v2374_v49 }
 0x2c7   : > { %v2439_v9 = vadd.f32 %v2422_v42, %v2414_v4  ;;  %v2440_v10 = vadd.f32 %v2426_v44, %v2415_v6  ;;  %v2441_v13 = vadd.f32 %v2430_v7, %v2416_v24  ;;  %v2442_v14 = vadd.f32 %v2434_v8, %v2417_v41 }
 0x2c9   : > { %v2443_v15 = vmax.f32 %v2439_v9, 0.0  ;;  %v2444_v16 = vmax.f32 %v2440_v10, 0.0  ;;  %v2445_v17 = vmax.f32 %v2441_v13, 0.0  ;;  %v2446_v21 = vmax.f32 %v2442_v14, 0.0 }
 0x2cb   : > { %2451 = vst [vmem:[%s2450_s26] sm:$0xff] %v2443_v15  ;;  %2452 = vst [vmem:[%s2450_s26 + $0x8] sm:$0xff] %v2444_v16 }
 0x2cc   : > { %2453 = vst [vmem:[%s2450_s26 + $0x10] sm:$0xff] %v2445_v17  ;;  %2454 = vst [vmem:[%s2450_s26 + $0x18] sm:$0xff] %v2446_v21 }
 0x2cd PF: > { %p2455_p6 = scmp.eq.s32.totalorder %s3701_s22, 1 }
 0x2cf   : > { %p2456_p8 = pnand %p2455_p6, %p2244_p10 }
 0x2d0   : > { %v2466_v18 = vlaneseq (!%p2456_p8)  ;;  %v2464_v20 = vld [vmem:[%s3686_s27] sm:$0xf] (!%p2456_p8)  ;;  %v2460_v22 = vld [vmem:[#allocation2] sm:$0xff] (!%p2456_p8) }
 0x2d1   : > { %2459 = sbr.rel (%p2456_p8) target bundleno = 732 (0x2dc), region = 64  ;;  %v2461_v29 = vld [vmem:[#allocation2 + $0x8] sm:$0xff] (!%p2456_p8) }
 0x2d2   : > { %v2467_v19 = vshrl.u32 (!%p2456_p8), %v2466_v18, 7  ;;  %v2462_v30 = vld [vmem:[#allocation2 + $0x10] sm:$0xff] (!%p2456_p8) }
 0x2d3   : > { %v2463_v31 = vld [vmem:[#allocation2 + $0x18] sm:$0xff] (!%p2456_p8) }
 0x2d4   : > { %v2468_v25 = vsub.s32 (!%p2456_p8), 0, %v2467_v19  ;;  %v2472_v26 = vsub.s32 (!%p2456_p8), 1, %v2467_v19  ;;  %v2476_v27 = vsub.s32 (!%p2456_p8), 2, %v2467_v19  ;;  %v2480_v28 = vsub.s32 (!%p2456_p8), 3, %v2467_v19 }
 0x2d6   : > { %v2469_v32 = vrot.slane (!%p2456_p8), %v2464_v20, %v2468_v25  ;;  %v2473_v33 = vrot.slane (!%p2456_p8), %v2464_v20, %v2472_v26  ;;  %v2477_v34 = vrot.slane (!%p2456_p8), %v2464_v20, %v2476_v27  ;;  %v2481_v35 = vrot.slane (!%p2456_p8), %v2464_v20, %v2480_v28 }
 0x2d8   : > { %v2486_v36 = vadd.f32 %v2469_v32, %v2460_v22  ;;  %v2487_v37 = vadd.f32 %v2473_v33, %v2461_v29  ;;  %v2488_v38 = vadd.f32 %v2477_v34, %v2462_v30  ;;  %v2489_v11 = vadd.f32 %v2481_v35, %v2463_v31 }
 0x2da   : > { %2490 = vst [vmem:[%s4089_s5] sm:$0xff] %v2486_v36  ;;  %2491 = vst [vmem:[%s4089_s5 + $0x8] sm:$0xff] %v2487_v37 }
 0x2db   : > { %2492 = vst [vmem:[%s4089_s5 + $0x10] sm:$0xff] %v2488_v38  ;;  %2493 = vst [vmem:[%s4089_s5 + $0x18] sm:$0xff] %v2489_v11 }
 0x2dc PF: > { %p22_p9 = scmp.ge.s32.totalorder %s3535_s7, 25   ;;  %s4100_s28 = smov %s3452_s29 }
 0x2dd   : > { %s4101_s29 = smov %s3456_s30  ;;  %s4102_s30 = smov %s3545_s10 }
 0x2de   : > { %s4103_s6 = smov %s3535_s7  ;;  %24 = sbr.rel (!%p22_p9) target bundleno = 17 (0x11), region = 114 }
 0x2e5   :  { %2505 = vsyncpa [#allocation7], 1 }
 0x2e6   :  { %2507 = vsyncpa [#allocation7 + $0x1], 1 }
 0x2e7   :  { %2508 = vsyncpa [#allocation9], 1 }
 0x2e8   :  { %2510 = vsyncpa [#allocation9 + $0x1], 1 }

</bundles_post_ra>
